<compile_context>
chip_gen: v7x
topology: tpu7x:2x2x1
jax: 0.10.0
libtpu: 0.0.40
codegen_flags: <defaults>
</compile_context>

<pallas_src>
import functools

import jax
import jax.numpy as jnp
import numpy as np
from jax.experimental import pallas as pl
from jax.experimental.pallas import tpu as pltpu


# ----------------------------------------------------------------------------
# Fused kernel: DeepSet (phi x3 -> max -> ro) -> z -> 4 MDN heads
# ----------------------------------------------------------------------------
def make_vopce_kernel(num_gauss, z_dim, out_lanes, h_dim=256):
    G = num_gauss
    H = h_dim
    bf16 = jnp.bfloat16

    def dot(a, b):
        # weights are already bf16; cast the activation, accumulate in f32.
        return jnp.dot(a.astype(bf16), b, preferred_element_type=jnp.float32)

    def relu(v):
        return jnp.maximum(v, 0.0)

    def kernel(x_ref, w0_ref, wds_ref, ro_w2z_ref, bias_ds_ref,
               w1_hbm, w2p_hbm, w3_hbm, bias_mdn_ref,
               out_ref,
               w1_v, w2p_v, w3_v, dma_sems):
        # --- kick off the MDN weight copies; they overlap the DeepSet chain -
        cp1 = pltpu.make_async_copy(w1_hbm, w1_v, dma_sems.at[0])
        cp2 = pltpu.make_async_copy(w2p_hbm, w2p_v, dma_sems.at[1])
        cp3 = pltpu.make_async_copy(w3_hbm, w3_v, dma_sems.at[2])
        cp1.start()
        cp2.start()
        cp3.start()

        def pe_tanh(h, wg, wl, bg):
            hm = jnp.mean(h, axis=0, keepdims=True)
            return jnp.tanh(dot(h, wg) + bg - dot(hm, wl))

        # --- DeepSet.phi : 3 x (PermEqui2_mean -> tanh) ----------------------
        h = pe_tanh(x_ref[...], w0_ref[0], w0_ref[1], bias_ds_ref[0:1, :])
        h = pe_tanh(h, wds_ref[0], wds_ref[1], bias_ds_ref[1:2, :])
        h = pe_tanh(h, wds_ref[2], wds_ref[3], bias_ds_ref[2:3, :])

        # --- DeepSet : max over the set dim -> Linear -> tanh -> Linear ------
        s = jnp.max(h, axis=0, keepdims=True)                       # (1, 256)
        hr = jnp.tanh(dot(s, wds_ref[4]) + bias_ds_ref[3:4, :])
        # only the z_mu half of the DeepSet output feeds the MDN in forward()
        z = dot(hr, ro_w2z_ref[...]) + bias_ds_ref[4:5, :z_dim]     # (1, z)

        # --- MDN weights must now be resident ---------------------------------
        cp1.wait()
        cp2.wait()
        cp3.wait()

        b1 = bias_mdn_ref[0:1, :]                                   # (1, 4H)
        b2 = bias_mdn_ref[1:2, :]                                   # (1, 4H)
        pi_b3 = bias_mdn_ref[2:3, 0:H]                              # (1, H)
        b3 = bias_mdn_ref[2:3, H:H + out_lanes]                     # (1, 128)

        # layer 1 of the four heads fused into one (z, 4H) matmul
        h1 = relu(dot(z, w1_v[...]) + b1)                           # (1, 4H)

        # layer 2: four 256x256 blocks on lane-aligned slices (no dense 1024²)
        h2p = relu(dot(h1[:, 0:H],     w2p_v[:, 0:H])     + b2[:, 0:H])
        h2m = relu(dot(h1[:, H:2 * H], w2p_v[:, H:2 * H]) + b2[:, H:2 * H])
        h2l = relu(dot(h1[:, 2 * H:3 * H], w2p_v[:, 2 * H:3 * H])
                   + b2[:, 2 * H:3 * H])
        h2u = relu(dot(h1[:, 3 * H:4 * H], w2p_v[:, 3 * H:4 * H])
                   + b2[:, 3 * H:4 * H])
        # pi head's extra hidden layer (packed as the 5th lane block of w2p)
        hpi = relu(dot(h2p, w2p_v[:, 4 * H:5 * H]) + pi_b3)

        # layer 3: four dots on 256-row slices of the block-diagonal (4H, 128)
        # weight (no h3 concatenate); their sum is the lane-dense output slab.
        raw = (dot(hpi, w3_v[0:H, :])
               + dot(h2m, w3_v[H:2 * H, :])
               + dot(h2l, w3_v[2 * H:3 * H, :])
               + dot(h2u, w3_v[3 * H:4 * H, :])
               + b3)                                                # (1, 128)

        # --- per-region activations on the lane-dense slab --------------------
        lane = jax.lax.broadcasted_iota(jnp.int32, raw.shape, 1)
        pi_m = lane < G
        mu_m = (lane >= G) & (lane < 4 * G)
        ex_m = (lane >= 4 * G) & (lane < 16 * G)

        # softmax over the pi region only (max-stabilized, exact division)
        logits = jnp.where(pi_m, raw, -1e30)
        mx = jnp.max(logits, axis=1, keepdims=True)
        e = jnp.where(pi_m, jnp.exp(logits - mx), 0.0)
        denom = jnp.sum(e, axis=1, keepdims=True)
        pi_v = e / denom

        # exp for the lam / U regions (mask first to avoid stray overflow)
        ex_v = jnp.exp(jnp.where(ex_m, raw, 0.0))

        out_ref[...] = jnp.where(pi_m, pi_v,
                                 jnp.where(mu_m, raw,
                                           jnp.where(ex_m, ex_v, 0.0)))

    return kernel


def vopce_forward(x, fp, num_gauss):
    """Full VOPCE forward: one fused pallas_call + cheap output split."""
    G = num_gauss
    z_dim = fp["ro_w2z"].shape[1]
    out_lanes = fp["mdn_w3"].shape[1]                               # >= 128
    vmem = pltpu.MemorySpace.VMEM

    args = (x, fp["w0"], fp["wds"], fp["ro_w2z"], fp["bias_ds"],
            fp["mdn_w1"], fp["mdn_w2p"], fp["mdn_w3"], fp["bias_mdn"])
    in_specs = (
        [pl.BlockSpec(memory_space=vmem)] * 5        # x + DeepSet weights
        + [pl.BlockSpec(memory_space=pl.ANY)] * 3    # MDN weights: manual DMA
        + [pl.BlockSpec(memory_space=vmem)]          # MDN biases
    )

    slab = pl.pallas_call(
        make_vopce_kernel(G, z_dim, out_lanes),
        out_shape=jax.ShapeDtypeStruct((1, out_lanes), jnp.float32),
        in_specs=in_specs,
        out_specs=pl.BlockSpec(memory_space=vmem),
        scratch_shapes=[
            pltpu.VMEM(fp["mdn_w1"].shape, fp["mdn_w1"].dtype),
            pltpu.VMEM(fp["mdn_w2p"].shape, fp["mdn_w2p"].dtype),
            pltpu.VMEM(fp["mdn_w3"].shape, fp["mdn_w3"].dtype),
            pltpu.SemaphoreType.DMA((3,)),
        ],
    )(*args)

    pi = slab[:, :G]
    mu = slab[:, G:4 * G].reshape(-1, G, 3)
    lam = slab[:, 4 * G:7 * G].reshape(-1, G, 3)
    U = slab[:, 7 * G:16 * G].reshape(-1, G, 3, 3)
    return pi, mu, lam, U


# ----------------------------------------------------------------------------
# Parameter construction (deterministic, torch nn.Linear-style uniform init)
# ----------------------------------------------------------------------------
def _linear(key, in_dim, out_dim, bias=True):
    kw, kb = jax.random.split(key)
    bound = 1.0 / np.sqrt(in_dim)
    w = jax.random.uniform(kw, (in_dim, out_dim), jnp.float32, -bound, bound)
    if not bias:
        return w, None
    b = jax.random.uniform(kb, (1, out_dim), jnp.float32, -bound, bound)
    return w, b


def init_params(key, x_dim, z_dim, num_gauss, h_dim=256):
    G = num_gauss
    keys = iter(jax.random.split(key, 64))
    p = {}
    # DeepSet phi: 3 PermEqui2_mean layers
    dims = [(x_dim, h_dim), (h_dim, h_dim), (h_dim, h_dim)]
    for i, (di, do) in enumerate(dims):
        wg, bg = _linear(next(keys), di, do, bias=True)
        wl, _ = _linear(next(keys), di, do, bias=False)
        p[f"phi{i}_wg"], p[f"phi{i}_bg"], p[f"phi{i}_wl"] = wg, bg, wl
    # DeepSet ro
    p["ro_w1"], p["ro_b1"] = _linear(next(keys), h_dim, h_dim)
    p["ro_w2"], p["ro_b2"] = _linear(next(keys), h_dim, 2 * z_dim)
    # MDN pi head
    p["pi_w1"], p["pi_b1"] = _linear(next(keys), z_dim, 256)
    p["pi_w2"], p["pi_b2"] = _linear(next(keys), 256, 256)
    p["pi_w3"], p["pi_b3"] = _linear(next(keys), 256, 256)
    p["pi_w4"], p["pi_b4"] = _linear(next(keys), 256, G)
    # MDN mu head
    p["mu_w1"], p["mu_b1"] = _linear(next(keys), z_dim, 256)
    p["mu_w2"], p["mu_b2"] = _linear(next(keys), 256, 256)
    p["mu_w3"], p["mu_b3"] = _linear(next(keys), 256, 3 * G)
    # MDN lam head
    p["lam_w1"], p["lam_b1"] = _linear(next(keys), z_dim, 256)
    p["lam_w2"], p["lam_b2"] = _linear(next(keys), 256, 256)
    p["lam_w3"], p["lam_b3"] = _linear(next(keys), 256, 3 * G)
    # MDN U head
    p["u_w1"], p["u_b1"] = _linear(next(keys), z_dim, 256)
    p["u_w2"], p["u_b2"] = _linear(next(keys), 256, 256)
    p["u_w3"], p["u_b3"] = _linear(next(keys), 256, 9 * G)
    return p


def _block_diag(blocks):
    rows = sum(b.shape[0] for b in blocks)
    cols = sum(b.shape[1] for b in blocks)
    out = jnp.zeros((rows, cols), jnp.float32)
    r = c = 0
    for b in blocks:
        out = out.at[r:r + b.shape[0], c:c + b.shape[1]].set(b)
        r += b.shape[0]
        c += b.shape[1]
    return out


def fuse_params(p, z_dim, num_gauss, h_dim=256):
    """One-time weight packing / bf16 cast for the fused kernel."""
    G = num_gauss
    bf16 = jnp.bfloat16
    f32 = jnp.float32
    fp = {}

    # DeepSet weights (auto-DMA'd VMEM operands).
    fp["w0"] = jnp.stack([p["phi0_wg"], p["phi0_wl"]]).astype(bf16)   # (2,x,256)
    fp["wds"] = jnp.stack([p["phi1_wg"], p["phi1_wl"],
                           p["phi2_wg"], p["phi2_wl"],
                           p["ro_w1"]]).astype(bf16)                  # (5,256,256)
    # only the z_mu half of ro's second linear feeds the forward pass
    fp["ro_w2z"] = p["ro_w2"][:, :z_dim].astype(bf16)                 # (256, z)
    ro_b2z = jnp.concatenate(
        [p["ro_b2"][:, :z_dim], jnp.zeros((1, h_dim - z_dim), f32)], axis=1)
    fp["bias_ds"] = jnp.concatenate(
        [p["phi0_bg"], p["phi1_bg"], p["phi2_bg"], p["ro_b1"], ro_b2z],
        axis=0).astype(f32)                                           # (5, 256)

    # MDN weights (memory_space=ANY, manually DMA'd inside the kernel).
    fp["mdn_w1"] = jnp.concatenate(
        [p["pi_w1"], p["mu_w1"], p["lam_w1"], p["u_w1"]],
        axis=1).astype(bf16)                                          # (z, 1024)
    fp["mdn_w2p"] = jnp.concatenate(
        [p["pi_w2"], p["mu_w2"], p["lam_w2"], p["u_w2"], p["pi_w3"]],
        axis=1).astype(bf16)                                          # (256,1280)
    w3 = _block_diag([p["pi_w4"], p["mu_w3"], p["lam_w3"], p["u_w3"]])
    out_lanes = max(128, ((16 * G + 127) // 128) * 128)
    fp["mdn_w3"] = jnp.pad(
        w3, ((0, 0), (0, out_lanes - 16 * G))).astype(bf16)           # (1024,128)

    # MDN biases packed into a (3, 1024) f32 slab.
    b1 = jnp.concatenate([p["pi_b1"], p["mu_b1"], p["lam_b1"], p["u_b1"]], axis=1)
    b2 = jnp.concatenate([p["pi_b2"], p["mu_b2"], p["lam_b2"], p["u_b2"]], axis=1)
    b3 = jnp.concatenate(
        [p["pi_b4"], p["mu_b3"], p["lam_b3"], p["u_b3"],
         jnp.zeros((1, out_lanes - 16 * G), f32)], axis=1)            # (1, 128)
    row2 = jnp.concatenate(
        [p["pi_b3"], b3,
         jnp.zeros((1, 4 * h_dim - h_dim - out_lanes), f32)], axis=1)
    fp["bias_mdn"] = jnp.concatenate([b1, b2, row2], axis=0)          # (3, 1024)
    return fp


# ----------------------------------------------------------------------------
# Pure-JAX f32 reference (uses the original, un-fused weights)
# ----------------------------------------------------------------------------
def vopce_reference(x, p, z_dim, G):
    def pe(h, wg, bg, wl):
        return jnp.tanh(h @ wg + bg - jnp.mean(h, 0, keepdims=True) @ wl)

    h = pe(x, p["phi0_wg"], p["phi0_bg"], p["phi0_wl"])
    h = pe(h, p["phi1_wg"], p["phi1_bg"], p["phi1_wl"])
    h = pe(h, p["phi2_wg"], p["phi2_bg"], p["phi2_wl"])
    s = jnp.max(h, axis=0, keepdims=True)
    ds = jnp.tanh(s @ p["ro_w1"] + p["ro_b1"]) @ p["ro_w2"] + p["ro_b2"]
    z = ds[:, :z_dim]

    relu = lambda v: jnp.maximum(v, 0.0)
    hpi = relu(z @ p["pi_w1"] + p["pi_b1"])
    hpi = relu(hpi @ p["pi_w2"] + p["pi_b2"])
    hpi = relu(hpi @ p["pi_w3"] + p["pi_b3"])
    pi = jax.nn.softmax(hpi @ p["pi_w4"] + p["pi_b4"], axis=1)
    hm = relu(z @ p["mu_w1"] + p["mu_b1"])
    hm = relu(hm @ p["mu_w2"] + p["mu_b2"])
    mu = (hm @ p["mu_w3"] + p["mu_b3"]).reshape(-1, G, 3)
    hl = relu(z @ p["lam_w1"] + p["lam_b1"])
    hl = relu(hl @ p["lam_w2"] + p["lam_b2"])
    lam = jnp.exp(hl @ p["lam_w3"] + p["lam_b3"]).reshape(-1, G, 3)
    hu = relu(z @ p["u_w1"] + p["u_b1"])
    hu = relu(hu @ p["u_w2"] + p["u_b2"])
    U = jnp.exp(hu @ p["u_w3"] + p["u_b3"]).reshape(-1, G, 3, 3)
    return pi, mu, lam, U


if __name__ == "__main__":
    # Small shapes consistent with the module: a set of N=8 points in 3-D,
    # latent z_dim=32, num_gaussians=4, DeepSet h_dim=256 (hard-coded in torch).
    x_dim, z_dim, num_gauss, N = 3, 32, 4, 8

    key = jax.random.PRNGKey(0)
    kx, kp = jax.random.split(key)
    x = jax.random.normal(kx, (N, x_dim), dtype=jnp.float32)
    params = init_params(kp, x_dim, z_dim, num_gauss)
    fused = fuse_params(params, z_dim, num_gauss)    # one-time preprocessing

    fwd = jax.jit(functools.partial(vopce_forward, num_gauss=num_gauss))
    pi, mu, lam, U = fwd(x, fused)
    jax.block_until_ready((pi, mu, lam, U))

    # Silent correctness check vs. the pure-JAX f32 reference (un-fused f32
    # weights).  The kernel uses bf16 weights/activation casts (per the perf
    # review), so tolerances are relaxed accordingly; real fusion/layout bugs
    # would produce errors orders of magnitude above these bounds.
    pi_r, mu_r, lam_r, U_r = vopce_reference(x, params, z_dim, num_gauss)
    assert pi.shape == (1, num_gauss)
    assert mu.shape == (1, num_gauss, 3)
    assert lam.shape == (1, num_gauss, 3)
    assert U.shape == (1, num_gauss, 3, 3)
    np.testing.assert_allclose(np.asarray(pi), np.asarray(pi_r),
                               rtol=5e-2, atol=1e-2)
    np.testing.assert_allclose(np.asarray(mu), np.asarray(mu_r),
                               rtol=5e-2, atol=1e-2)
    np.testing.assert_allclose(np.asarray(lam), np.asarray(lam_r),
                               rtol=5e-2, atol=1e-2)
    np.testing.assert_allclose(np.asarray(U), np.asarray(U_r),
                               rtol=5e-2, atol=1e-2)

    print("KERNEL_OK")
</pallas_src>

<mosaic_0001>
module attributes {stable_mosaic.version = 11 : i64} {
  func.func @kernel(%arg0: memref<8x3xf32, #tpu.memory_space<vmem>>, %arg1: memref<2x3x256xbf16, #tpu.memory_space<vmem>>, %arg2: memref<5x256x256xbf16, #tpu.memory_space<vmem>>, %arg3: memref<256x32xbf16, #tpu.memory_space<vmem>>, %arg4: memref<5x256xf32, #tpu.memory_space<vmem>>, %arg5: memref<32x1024xbf16, #tpu.memory_space<any>>, %arg6: memref<256x1280xbf16, #tpu.memory_space<any>>, %arg7: memref<1024x128xbf16, #tpu.memory_space<any>>, %arg8: memref<3x1024xf32, #tpu.memory_space<vmem>>, %arg9: memref<1x128xf32, #tpu.memory_space<vmem>>, %arg10: memref<32x1024xbf16, #tpu.memory_space<vmem>>, %arg11: memref<256x1280xbf16, #tpu.memory_space<vmem>>, %arg12: memref<1024x128xbf16, #tpu.memory_space<vmem>>, %arg13: memref<3x!tpu.dma_semaphore, #tpu.memory_space<semaphore_mem>>) attributes {dimension_semantics = [], scalar_prefetch = 0 : i64, scratch_operands = 4 : i64, tpu.core_type = #tpu.core_type<tc>} {
    %c0_i32 = arith.constant 0 : i32
    %0 = tpu.memref_slice %arg13[%c0_i32] : memref<3x!tpu.dma_semaphore, #tpu.memory_space<semaphore_mem>> -> memref<1x!tpu.dma_semaphore, #tpu.memory_space<semaphore_mem>>
    %1 = tpu.memref_squeeze %0 : memref<1x!tpu.dma_semaphore, #tpu.memory_space<semaphore_mem>> -> memref<!tpu.dma_semaphore, #tpu.memory_space<semaphore_mem>>
    tpu.enqueue_dma source(%arg5 : memref<32x1024xbf16, #tpu.memory_space<any>>) target(%arg10 : memref<32x1024xbf16, #tpu.memory_space<vmem>>) target_semaphore(%1 : memref<!tpu.dma_semaphore, #tpu.memory_space<semaphore_mem>>)
    %c1_i32 = arith.constant 1 : i32
    %2 = tpu.memref_slice %arg13[%c1_i32] : memref<3x!tpu.dma_semaphore, #tpu.memory_space<semaphore_mem>> -> memref<1x!tpu.dma_semaphore, #tpu.memory_space<semaphore_mem>>
    %3 = tpu.memref_squeeze %2 : memref<1x!tpu.dma_semaphore, #tpu.memory_space<semaphore_mem>> -> memref<!tpu.dma_semaphore, #tpu.memory_space<semaphore_mem>>
    tpu.enqueue_dma source(%arg6 : memref<256x1280xbf16, #tpu.memory_space<any>>) target(%arg11 : memref<256x1280xbf16, #tpu.memory_space<vmem>>) target_semaphore(%3 : memref<!tpu.dma_semaphore, #tpu.memory_space<semaphore_mem>>)
    %c2_i32 = arith.constant 2 : i32
    %4 = tpu.memref_slice %arg13[%c2_i32] : memref<3x!tpu.dma_semaphore, #tpu.memory_space<semaphore_mem>> -> memref<1x!tpu.dma_semaphore, #tpu.memory_space<semaphore_mem>>
    %5 = tpu.memref_squeeze %4 : memref<1x!tpu.dma_semaphore, #tpu.memory_space<semaphore_mem>> -> memref<!tpu.dma_semaphore, #tpu.memory_space<semaphore_mem>>
    tpu.enqueue_dma source(%arg7 : memref<1024x128xbf16, #tpu.memory_space<any>>) target(%arg12 : memref<1024x128xbf16, #tpu.memory_space<vmem>>) target_semaphore(%5 : memref<!tpu.dma_semaphore, #tpu.memory_space<semaphore_mem>>)
    %c0 = arith.constant 0 : index
    %c0_0 = arith.constant 0 : index
    %6 = vector.load %arg0[%c0, %c0_0] : memref<8x3xf32, #tpu.memory_space<vmem>>, vector<8x3xf32>
    %c0_1 = arith.constant 0 : index
    %c0_2 = arith.constant 0 : index
    %c0_3 = arith.constant 0 : index
    %7 = vector.load %arg1[%c0_1, %c0_2, %c0_3] : memref<2x3x256xbf16, #tpu.memory_space<vmem>>, vector<1x3x256xbf16>
    %8 = vector.shape_cast %7 : vector<1x3x256xbf16> to vector<3x256xbf16>
    %c1 = arith.constant 1 : index
    %c0_4 = arith.constant 0 : index
    %c0_5 = arith.constant 0 : index
    %9 = vector.load %arg1[%c1, %c0_4, %c0_5] : memref<2x3x256xbf16, #tpu.memory_space<vmem>>, vector<1x3x256xbf16>
    %10 = vector.shape_cast %9 : vector<1x3x256xbf16> to vector<3x256xbf16>
    %c0_6 = arith.constant 0 : index
    %c0_7 = arith.constant 0 : index
    %11 = vector.load %arg4[%c0_6, %c0_7] : memref<5x256xf32, #tpu.memory_space<vmem>>, vector<1x256xf32>
    %cst = arith.constant dense<0.000000e+00> : vector<3xf32>
    %12 = vector.multi_reduction <add>, %6, %cst [0] : vector<8x3xf32> to vector<3xf32>
    %13 = vector.shape_cast %12 : vector<3xf32> to vector<1x3xf32>
    %cst_8 = arith.constant 8.000000e+00 : f32
    %14 = vector.broadcast %cst_8 : f32 to vector<1x3xf32>
    %15 = arith.divf %13, %14 : vector<1x3xf32>
    %16 = arith.truncf %6 : vector<8x3xf32> to vector<8x3xbf16>
    %cst_9 = arith.constant dense<0.000000e+00> : vector<8x256xf32>
    %17 = tpu.matmul %16, %8, %cst_9 {dimension_numbers = #tpu.dot_dimension_numbers<[1], [0], [0], [1], [0, 0, 1, 1], [], []>} : vector<8x3xbf16>, vector<3x256xbf16>, vector<8x256xf32> -> vector<8x256xf32>
    %18 = vector.broadcast %11 : vector<1x256xf32> to vector<8x256xf32>
    %19 = arith.addf %17, %18 : vector<8x256xf32>
    %20 = arith.truncf %15 : vector<1x3xf32> to vector<1x3xbf16>
    %cst_10 = arith.constant dense<0.000000e+00> : vector<1x256xf32>
    %21 = tpu.matmul %20, %10, %cst_10 {dimension_numbers = #tpu.dot_dimension_numbers<[1], [0], [0], [1], [0, 0, 1, 1], [], []>} : vector<1x3xbf16>, vector<3x256xbf16>, vector<1x256xf32> -> vector<1x256xf32>
    %22 = vector.broadcast %21 : vector<1x256xf32> to vector<8x256xf32>
    %23 = arith.subf %19, %22 : vector<8x256xf32>
    %24 = math.tanh %23 : vector<8x256xf32>
    %c0_11 = arith.constant 0 : index
    %c0_12 = arith.constant 0 : index
    %c0_13 = arith.constant 0 : index
    %25 = vector.load %arg2[%c0_11, %c0_12, %c0_13] : memref<5x256x256xbf16, #tpu.memory_space<vmem>>, vector<1x256x256xbf16>
    %26 = vector.shape_cast %25 : vector<1x256x256xbf16> to vector<256x256xbf16>
    %c1_14 = arith.constant 1 : index
    %c0_15 = arith.constant 0 : index
    %c0_16 = arith.constant 0 : index
    %27 = vector.load %arg2[%c1_14, %c0_15, %c0_16] : memref<5x256x256xbf16, #tpu.memory_space<vmem>>, vector<1x256x256xbf16>
    %28 = vector.shape_cast %27 : vector<1x256x256xbf16> to vector<256x256xbf16>
    %c1_17 = arith.constant 1 : index
    %c0_18 = arith.constant 0 : index
    %29 = vector.load %arg4[%c1_17, %c0_18] : memref<5x256xf32, #tpu.memory_space<vmem>>, vector<1x256xf32>
    %cst_19 = arith.constant dense<0.000000e+00> : vector<256xf32>
    %30 = vector.multi_reduction <add>, %24, %cst_19 [0] : vector<8x256xf32> to vector<256xf32>
    %31 = vector.shape_cast %30 : vector<256xf32> to vector<1x256xf32>
    %cst_20 = arith.constant 8.000000e+00 : f32
    %32 = vector.broadcast %cst_20 : f32 to vector<1x256xf32>
    %33 = arith.divf %31, %32 : vector<1x256xf32>
    %34 = arith.truncf %24 : vector<8x256xf32> to vector<8x256xbf16>
    %cst_21 = arith.constant dense<0.000000e+00> : vector<8x256xf32>
    %35 = tpu.matmul %34, %26, %cst_21 {dimension_numbers = #tpu.dot_dimension_numbers<[1], [0], [0], [1], [0, 0, 1, 1], [], []>} : vector<8x256xbf16>, vector<256x256xbf16>, vector<8x256xf32> -> vector<8x256xf32>
    %36 = vector.broadcast %29 : vector<1x256xf32> to vector<8x256xf32>
    %37 = arith.addf %35, %36 : vector<8x256xf32>
    %38 = arith.truncf %33 : vector<1x256xf32> to vector<1x256xbf16>
    %cst_22 = arith.constant dense<0.000000e+00> : vector<1x256xf32>
    %39 = tpu.matmul %38, %28, %cst_22 {dimension_numbers = #tpu.dot_dimension_numbers<[1], [0], [0], [1], [0, 0, 1, 1], [], []>} : vector<1x256xbf16>, vector<256x256xbf16>, vector<1x256xf32> -> vector<1x256xf32>
    %40 = vector.broadcast %39 : vector<1x256xf32> to vector<8x256xf32>
    %41 = arith.subf %37, %40 : vector<8x256xf32>
    %42 = math.tanh %41 : vector<8x256xf32>
    %c2 = arith.constant 2 : index
    %c0_23 = arith.constant 0 : index
    %c0_24 = arith.constant 0 : index
    %43 = vector.load %arg2[%c2, %c0_23, %c0_24] : memref<5x256x256xbf16, #tpu.memory_space<vmem>>, vector<1x256x256xbf16>
    %44 = vector.shape_cast %43 : vector<1x256x256xbf16> to vector<256x256xbf16>
    %c3 = arith.constant 3 : index
    %c0_25 = arith.constant 0 : index
    %c0_26 = arith.constant 0 : index
    %45 = vector.load %arg2[%c3, %c0_25, %c0_26] : memref<5x256x256xbf16, #tpu.memory_space<vmem>>, vector<1x256x256xbf16>
    %46 = vector.shape_cast %45 : vector<1x256x256xbf16> to vector<256x256xbf16>
    %c2_27 = arith.constant 2 : index
    %c0_28 = arith.constant 0 : index
    %47 = vector.load %arg4[%c2_27, %c0_28] : memref<5x256xf32, #tpu.memory_space<vmem>>, vector<1x256xf32>
    %cst_29 = arith.constant dense<0.000000e+00> : vector<256xf32>
    %48 = vector.multi_reduction <add>, %42, %cst_29 [0] : vector<8x256xf32> to vector<256xf32>
    %49 = vector.shape_cast %48 : vector<256xf32> to vector<1x256xf32>
    %cst_30 = arith.constant 8.000000e+00 : f32
    %50 = vector.broadcast %cst_30 : f32 to vector<1x256xf32>
    %51 = arith.divf %49, %50 : vector<1x256xf32>
    %52 = arith.truncf %42 : vector<8x256xf32> to vector<8x256xbf16>
    %cst_31 = arith.constant dense<0.000000e+00> : vector<8x256xf32>
    %53 = tpu.matmul %52, %44, %cst_31 {dimension_numbers = #tpu.dot_dimension_numbers<[1], [0], [0], [1], [0, 0, 1, 1], [], []>} : vector<8x256xbf16>, vector<256x256xbf16>, vector<8x256xf32> -> vector<8x256xf32>
    %54 = vector.broadcast %47 : vector<1x256xf32> to vector<8x256xf32>
    %55 = arith.addf %53, %54 : vector<8x256xf32>
    %56 = arith.truncf %51 : vector<1x256xf32> to vector<1x256xbf16>
    %cst_32 = arith.constant dense<0.000000e+00> : vector<1x256xf32>
    %57 = tpu.matmul %56, %46, %cst_32 {dimension_numbers = #tpu.dot_dimension_numbers<[1], [0], [0], [1], [0, 0, 1, 1], [], []>} : vector<1x256xbf16>, vector<256x256xbf16>, vector<1x256xf32> -> vector<1x256xf32>
    %58 = vector.broadcast %57 : vector<1x256xf32> to vector<8x256xf32>
    %59 = arith.subf %55, %58 : vector<8x256xf32>
    %60 = math.tanh %59 : vector<8x256xf32>
    %cst_33 = arith.constant dense<0xFF800000> : vector<256xf32>
    %61 = vector.multi_reduction <maximumf>, %60, %cst_33 [0] : vector<8x256xf32> to vector<256xf32>
    %62 = vector.shape_cast %61 : vector<256xf32> to vector<1x256xf32>
    %c4 = arith.constant 4 : index
    %c0_34 = arith.constant 0 : index
    %c0_35 = arith.constant 0 : index
    %63 = vector.load %arg2[%c4, %c0_34, %c0_35] : memref<5x256x256xbf16, #tpu.memory_space<vmem>>, vector<1x256x256xbf16>
    %64 = vector.shape_cast %63 : vector<1x256x256xbf16> to vector<256x256xbf16>
    %65 = arith.truncf %62 : vector<1x256xf32> to vector<1x256xbf16>
    %cst_36 = arith.constant dense<0.000000e+00> : vector<1x256xf32>
    %66 = tpu.matmul %65, %64, %cst_36 {dimension_numbers = #tpu.dot_dimension_numbers<[1], [0], [0], [1], [0, 0, 1, 1], [], []>} : vector<1x256xbf16>, vector<256x256xbf16>, vector<1x256xf32> -> vector<1x256xf32>
    %c3_37 = arith.constant 3 : index
    %c0_38 = arith.constant 0 : index
    %67 = vector.load %arg4[%c3_37, %c0_38] : memref<5x256xf32, #tpu.memory_space<vmem>>, vector<1x256xf32>
    %68 = arith.addf %66, %67 : vector<1x256xf32>
    %69 = math.tanh %68 : vector<1x256xf32>
    %c0_39 = arith.constant 0 : index
    %c0_40 = arith.constant 0 : index
    %70 = vector.load %arg3[%c0_39, %c0_40] : memref<256x32xbf16, #tpu.memory_space<vmem>>, vector<256x32xbf16>
    %71 = arith.truncf %69 : vector<1x256xf32> to vector<1x256xbf16>
    %cst_41 = arith.constant dense<0.000000e+00> : vector<1x32xf32>
    %72 = tpu.matmul %71, %70, %cst_41 {dimension_numbers = #tpu.dot_dimension_numbers<[1], [0], [0], [1], [0, 0, 1, 1], [], []>} : vector<1x256xbf16>, vector<256x32xbf16>, vector<1x32xf32> -> vector<1x32xf32>
    %c4_42 = arith.constant 4 : index
    %c0_43 = arith.constant 0 : index
    %73 = vector.load %arg4[%c4_42, %c0_43] : memref<5x256xf32, #tpu.memory_space<vmem>>, vector<1x32xf32>
    %74 = arith.addf %72, %73 : vector<1x32xf32>
    %c0_i32_44 = arith.constant 0 : i32
    %75 = tpu.memref_slice %arg13[%c0_i32_44] : memref<3x!tpu.dma_semaphore, #tpu.memory_space<semaphore_mem>> -> memref<1x!tpu.dma_semaphore, #tpu.memory_space<semaphore_mem>>
    %76 = tpu.memref_squeeze %75 : memref<1x!tpu.dma_semaphore, #tpu.memory_space<semaphore_mem>> -> memref<!tpu.dma_semaphore, #tpu.memory_space<semaphore_mem>>
    tpu.wait_dma2 semaphore(%76 : memref<!tpu.dma_semaphore, #tpu.memory_space<semaphore_mem>>) src(%arg5 : memref<32x1024xbf16, #tpu.memory_space<any>>) dst(%arg10 : memref<32x1024xbf16, #tpu.memory_space<vmem>>)
    %c1_i32_45 = arith.constant 1 : i32
    %77 = tpu.memref_slice %arg13[%c1_i32_45] : memref<3x!tpu.dma_semaphore, #tpu.memory_space<semaphore_mem>> -> memref<1x!tpu.dma_semaphore, #tpu.memory_space<semaphore_mem>>
    %78 = tpu.memref_squeeze %77 : memref<1x!tpu.dma_semaphore, #tpu.memory_space<semaphore_mem>> -> memref<!tpu.dma_semaphore, #tpu.memory_space<semaphore_mem>>
    tpu.wait_dma2 semaphore(%78 : memref<!tpu.dma_semaphore, #tpu.memory_space<semaphore_mem>>) src(%arg6 : memref<256x1280xbf16, #tpu.memory_space<any>>) dst(%arg11 : memref<256x1280xbf16, #tpu.memory_space<vmem>>)
    %c2_i32_46 = arith.constant 2 : i32
    %79 = tpu.memref_slice %arg13[%c2_i32_46] : memref<3x!tpu.dma_semaphore, #tpu.memory_space<semaphore_mem>> -> memref<1x!tpu.dma_semaphore, #tpu.memory_space<semaphore_mem>>
    %80 = tpu.memref_squeeze %79 : memref<1x!tpu.dma_semaphore, #tpu.memory_space<semaphore_mem>> -> memref<!tpu.dma_semaphore, #tpu.memory_space<semaphore_mem>>
    tpu.wait_dma2 semaphore(%80 : memref<!tpu.dma_semaphore, #tpu.memory_space<semaphore_mem>>) src(%arg7 : memref<1024x128xbf16, #tpu.memory_space<any>>) dst(%arg12 : memref<1024x128xbf16, #tpu.memory_space<vmem>>)
    %c0_47 = arith.constant 0 : index
    %c0_48 = arith.constant 0 : index
    %81 = vector.load %arg8[%c0_47, %c0_48] : memref<3x1024xf32, #tpu.memory_space<vmem>>, vector<1x1024xf32>
    %c1_49 = arith.constant 1 : index
    %c0_50 = arith.constant 0 : index
    %82 = vector.load %arg8[%c1_49, %c0_50] : memref<3x1024xf32, #tpu.memory_space<vmem>>, vector<1x1024xf32>
    %c2_51 = arith.constant 2 : index
    %c0_52 = arith.constant 0 : index
    %83 = vector.load %arg8[%c2_51, %c0_52] : memref<3x1024xf32, #tpu.memory_space<vmem>>, vector<1x256xf32>
    %c2_53 = arith.constant 2 : index
    %c256 = arith.constant 256 : index
    %84 = vector.load %arg8[%c2_53, %c256] : memref<3x1024xf32, #tpu.memory_space<vmem>>, vector<1x128xf32>
    %c0_54 = arith.constant 0 : index
    %c0_55 = arith.constant 0 : index
    %85 = vector.load %arg10[%c0_54, %c0_55] : memref<32x1024xbf16, #tpu.memory_space<vmem>>, vector<32x1024xbf16>
    %86 = arith.truncf %74 : vector<1x32xf32> to vector<1x32xbf16>
    %cst_56 = arith.constant dense<0.000000e+00> : vector<1x1024xf32>
    %87 = tpu.matmul %86, %85, %cst_56 {dimension_numbers = #tpu.dot_dimension_numbers<[1], [0], [0], [1], [0, 0, 1, 1], [], []>} : vector<1x32xbf16>, vector<32x1024xbf16>, vector<1x1024xf32> -> vector<1x1024xf32>
    %88 = arith.addf %87, %81 : vector<1x1024xf32>
    %cst_57 = arith.constant 0.000000e+00 : f32
    %89 = vector.broadcast %cst_57 : f32 to vector<1x1024xf32>
    %90 = arith.maximumf %88, %89 : vector<1x1024xf32>
    %91 = vector.extract_strided_slice %90 {offsets = [0, 0], sizes = [1, 256], strides = [1, 1]} : vector<1x1024xf32> to vector<1x256xf32>
    %c0_58 = arith.constant 0 : index
    %c0_59 = arith.constant 0 : index
    %92 = vector.load %arg11[%c0_58, %c0_59] : memref<256x1280xbf16, #tpu.memory_space<vmem>>, vector<256x256xbf16>
    %93 = arith.truncf %91 : vector<1x256xf32> to vector<1x256xbf16>
    %cst_60 = arith.constant dense<0.000000e+00> : vector<1x256xf32>
    %94 = tpu.matmul %93, %92, %cst_60 {dimension_numbers = #tpu.dot_dimension_numbers<[1], [0], [0], [1], [0, 0, 1, 1], [], []>} : vector<1x256xbf16>, vector<256x256xbf16>, vector<1x256xf32> -> vector<1x256xf32>
    %95 = vector.extract_strided_slice %82 {offsets = [0, 0], sizes = [1, 256], strides = [1, 1]} : vector<1x1024xf32> to vector<1x256xf32>
    %96 = arith.addf %94, %95 : vector<1x256xf32>
    %cst_61 = arith.constant 0.000000e+00 : f32
    %97 = vector.broadcast %cst_61 : f32 to vector<1x256xf32>
    %98 = arith.maximumf %96, %97 : vector<1x256xf32>
    %99 = vector.extract_strided_slice %90 {offsets = [0, 256], sizes = [1, 256], strides = [1, 1]} : vector<1x1024xf32> to vector<1x256xf32>
    %c0_62 = arith.constant 0 : index
    %c256_63 = arith.constant 256 : index
    %100 = vector.load %arg11[%c0_62, %c256_63] : memref<256x1280xbf16, #tpu.memory_space<vmem>>, vector<256x256xbf16>
    %101 = arith.truncf %99 : vector<1x256xf32> to vector<1x256xbf16>
    %cst_64 = arith.constant dense<0.000000e+00> : vector<1x256xf32>
    %102 = tpu.matmul %101, %100, %cst_64 {dimension_numbers = #tpu.dot_dimension_numbers<[1], [0], [0], [1], [0, 0, 1, 1], [], []>} : vector<1x256xbf16>, vector<256x256xbf16>, vector<1x256xf32> -> vector<1x256xf32>
    %103 = vector.extract_strided_slice %82 {offsets = [0, 256], sizes = [1, 256], strides = [1, 1]} : vector<1x1024xf32> to vector<1x256xf32>
    %104 = arith.addf %102, %103 : vector<1x256xf32>
    %cst_65 = arith.constant 0.000000e+00 : f32
    %105 = vector.broadcast %cst_65 : f32 to vector<1x256xf32>
    %106 = arith.maximumf %104, %105 : vector<1x256xf32>
    %107 = vector.extract_strided_slice %90 {offsets = [0, 512], sizes = [1, 256], strides = [1, 1]} : vector<1x1024xf32> to vector<1x256xf32>
    %c0_66 = arith.constant 0 : index
    %c512 = arith.constant 512 : index
    %108 = vector.load %arg11[%c0_66, %c512] : memref<256x1280xbf16, #tpu.memory_space<vmem>>, vector<256x256xbf16>
    %109 = arith.truncf %107 : vector<1x256xf32> to vector<1x256xbf16>
    %cst_67 = arith.constant dense<0.000000e+00> : vector<1x256xf32>
    %110 = tpu.matmul %109, %108, %cst_67 {dimension_numbers = #tpu.dot_dimension_numbers<[1], [0], [0], [1], [0, 0, 1, 1], [], []>} : vector<1x256xbf16>, vector<256x256xbf16>, vector<1x256xf32> -> vector<1x256xf32>
    %111 = vector.extract_strided_slice %82 {offsets = [0, 512], sizes = [1, 256], strides = [1, 1]} : vector<1x1024xf32> to vector<1x256xf32>
    %112 = arith.addf %110, %111 : vector<1x256xf32>
    %cst_68 = arith.constant 0.000000e+00 : f32
    %113 = vector.broadcast %cst_68 : f32 to vector<1x256xf32>
    %114 = arith.maximumf %112, %113 : vector<1x256xf32>
    %115 = vector.extract_strided_slice %90 {offsets = [0, 768], sizes = [1, 256], strides = [1, 1]} : vector<1x1024xf32> to vector<1x256xf32>
    %c0_69 = arith.constant 0 : index
    %c768 = arith.constant 768 : index
    %116 = vector.load %arg11[%c0_69, %c768] : memref<256x1280xbf16, #tpu.memory_space<vmem>>, vector<256x256xbf16>
    %117 = arith.truncf %115 : vector<1x256xf32> to vector<1x256xbf16>
    %cst_70 = arith.constant dense<0.000000e+00> : vector<1x256xf32>
    %118 = tpu.matmul %117, %116, %cst_70 {dimension_numbers = #tpu.dot_dimension_numbers<[1], [0], [0], [1], [0, 0, 1, 1], [], []>} : vector<1x256xbf16>, vector<256x256xbf16>, vector<1x256xf32> -> vector<1x256xf32>
    %119 = vector.extract_strided_slice %82 {offsets = [0, 768], sizes = [1, 256], strides = [1, 1]} : vector<1x1024xf32> to vector<1x256xf32>
    %120 = arith.addf %118, %119 : vector<1x256xf32>
    %cst_71 = arith.constant 0.000000e+00 : f32
    %121 = vector.broadcast %cst_71 : f32 to vector<1x256xf32>
    %122 = arith.maximumf %120, %121 : vector<1x256xf32>
    %c0_72 = arith.constant 0 : index
    %c1024 = arith.constant 1024 : index
    %123 = vector.load %arg11[%c0_72, %c1024] : memref<256x1280xbf16, #tpu.memory_space<vmem>>, vector<256x256xbf16>
    %124 = arith.truncf %98 : vector<1x256xf32> to vector<1x256xbf16>
    %cst_73 = arith.constant dense<0.000000e+00> : vector<1x256xf32>
    %125 = tpu.matmul %124, %123, %cst_73 {dimension_numbers = #tpu.dot_dimension_numbers<[1], [0], [0], [1], [0, 0, 1, 1], [], []>} : vector<1x256xbf16>, vector<256x256xbf16>, vector<1x256xf32> -> vector<1x256xf32>
    %126 = arith.addf %125, %83 : vector<1x256xf32>
    %cst_74 = arith.constant 0.000000e+00 : f32
    %127 = vector.broadcast %cst_74 : f32 to vector<1x256xf32>
    %128 = arith.maximumf %126, %127 : vector<1x256xf32>
    %c0_75 = arith.constant 0 : index
    %c0_76 = arith.constant 0 : index
    %129 = vector.load %arg12[%c0_75, %c0_76] : memref<1024x128xbf16, #tpu.memory_space<vmem>>, vector<256x128xbf16>
    %130 = arith.truncf %128 : vector<1x256xf32> to vector<1x256xbf16>
    %cst_77 = arith.constant dense<0.000000e+00> : vector<1x128xf32>
    %131 = tpu.matmul %130, %129, %cst_77 {dimension_numbers = #tpu.dot_dimension_numbers<[1], [0], [0], [1], [0, 0, 1, 1], [], []>} : vector<1x256xbf16>, vector<256x128xbf16>, vector<1x128xf32> -> vector<1x128xf32>
    %c256_78 = arith.constant 256 : index
    %c0_79 = arith.constant 0 : index
    %132 = vector.load %arg12[%c256_78, %c0_79] : memref<1024x128xbf16, #tpu.memory_space<vmem>>, vector<256x128xbf16>
    %133 = arith.truncf %106 : vector<1x256xf32> to vector<1x256xbf16>
    %cst_80 = arith.constant dense<0.000000e+00> : vector<1x128xf32>
    %134 = tpu.matmul %133, %132, %cst_80 {dimension_numbers = #tpu.dot_dimension_numbers<[1], [0], [0], [1], [0, 0, 1, 1], [], []>} : vector<1x256xbf16>, vector<256x128xbf16>, vector<1x128xf32> -> vector<1x128xf32>
    %135 = arith.addf %131, %134 : vector<1x128xf32>
    %c512_81 = arith.constant 512 : index
    %c0_82 = arith.constant 0 : index
    %136 = vector.load %arg12[%c512_81, %c0_82] : memref<1024x128xbf16, #tpu.memory_space<vmem>>, vector<256x128xbf16>
    %137 = arith.truncf %114 : vector<1x256xf32> to vector<1x256xbf16>
    %cst_83 = arith.constant dense<0.000000e+00> : vector<1x128xf32>
    %138 = tpu.matmul %137, %136, %cst_83 {dimension_numbers = #tpu.dot_dimension_numbers<[1], [0], [0], [1], [0, 0, 1, 1], [], []>} : vector<1x256xbf16>, vector<256x128xbf16>, vector<1x128xf32> -> vector<1x128xf32>
    %139 = arith.addf %135, %138 : vector<1x128xf32>
    %c768_84 = arith.constant 768 : index
    %c0_85 = arith.constant 0 : index
    %140 = vector.load %arg12[%c768_84, %c0_85] : memref<1024x128xbf16, #tpu.memory_space<vmem>>, vector<256x128xbf16>
    %141 = arith.truncf %122 : vector<1x256xf32> to vector<1x256xbf16>
    %cst_86 = arith.constant dense<0.000000e+00> : vector<1x128xf32>
    %142 = tpu.matmul %141, %140, %cst_86 {dimension_numbers = #tpu.dot_dimension_numbers<[1], [0], [0], [1], [0, 0, 1, 1], [], []>} : vector<1x256xbf16>, vector<256x128xbf16>, vector<1x128xf32> -> vector<1x128xf32>
    %143 = arith.addf %139, %142 : vector<1x128xf32>
    %144 = arith.addf %143, %84 : vector<1x128xf32>
    %145 = tpu.iota {dimensions = array<i32: 1>} : vector<1x128xi32>
    %c4_i32 = arith.constant 4 : i32
    %146 = vector.broadcast %c4_i32 : i32 to vector<1x128xi32>
    %147 = arith.cmpi slt, %145, %146 : vector<1x128xi32>
    %c4_i32_87 = arith.constant 4 : i32
    %148 = vector.broadcast %c4_i32_87 : i32 to vector<1x128xi32>
    %149 = arith.cmpi sge, %145, %148 : vector<1x128xi32>
    %c16_i32 = arith.constant 16 : i32
    %150 = vector.broadcast %c16_i32 : i32 to vector<1x128xi32>
    %151 = arith.cmpi slt, %145, %150 : vector<1x128xi32>
    %152 = arith.andi %149, %151 : vector<1x128xi1>
    %c16_i32_88 = arith.constant 16 : i32
    %153 = vector.broadcast %c16_i32_88 : i32 to vector<1x128xi32>
    %154 = arith.cmpi sge, %145, %153 : vector<1x128xi32>
    %c64_i32 = arith.constant 64 : i32
    %155 = vector.broadcast %c64_i32 : i32 to vector<1x128xi32>
    %156 = arith.cmpi slt, %145, %155 : vector<1x128xi32>
    %157 = arith.andi %154, %156 : vector<1x128xi1>
    %cst_89 = arith.constant -1.000000e+30 : f32
    %158 = vector.broadcast %cst_89 : f32 to vector<1x128xf32>
    %159 = arith.select %147, %144, %158 : vector<1x128xi1>, vector<1x128xf32>
    %cst_90 = arith.constant dense<0xFF800000> : vector<1xf32>
    %160 = vector.multi_reduction <maximumf>, %159, %cst_90 [1] : vector<1x128xf32> to vector<1xf32>
    %161 = vector.shape_cast %160 : vector<1xf32> to vector<1x1xf32>
    %162 = vector.broadcast %161 : vector<1x1xf32> to vector<1x128xf32>
    %163 = arith.subf %159, %162 : vector<1x128xf32>
    %164 = math.exp %163 : vector<1x128xf32>
    %cst_91 = arith.constant 0.000000e+00 : f32
    %165 = vector.broadcast %cst_91 : f32 to vector<1x128xf32>
    %166 = arith.select %147, %164, %165 : vector<1x128xi1>, vector<1x128xf32>
    %cst_92 = arith.constant dense<0.000000e+00> : vector<1xf32>
    %167 = vector.multi_reduction <add>, %166, %cst_92 [1] : vector<1x128xf32> to vector<1xf32>
    %168 = vector.shape_cast %167 : vector<1xf32> to vector<1x1xf32>
    %169 = vector.broadcast %168 : vector<1x1xf32> to vector<1x128xf32>
    %170 = arith.divf %166, %169 : vector<1x128xf32>
    %cst_93 = arith.constant 0.000000e+00 : f32
    %171 = vector.broadcast %cst_93 : f32 to vector<1x128xf32>
    %172 = arith.select %157, %144, %171 : vector<1x128xi1>, vector<1x128xf32>
    %173 = math.exp %172 : vector<1x128xf32>
    %cst_94 = arith.constant 0.000000e+00 : f32
    %174 = vector.broadcast %cst_94 : f32 to vector<1x128xf32>
    %175 = arith.select %157, %173, %174 : vector<1x128xi1>, vector<1x128xf32>
    %176 = arith.select %152, %144, %175 : vector<1x128xi1>, vector<1x128xf32>
    %177 = arith.select %147, %170, %176 : vector<1x128xi1>, vector<1x128xf32>
    %c0_95 = arith.constant 0 : index
    %c0_96 = arith.constant 0 : index
    %178 = vector.load %arg9[%c0_95, %c0_96] : memref<1x128xf32, #tpu.memory_space<vmem>>, vector<1x128xf32>
    tpu.vector_store %arg9[%c0_95, %c0_96], %177 {strides = array<i32>} : memref<1x128xf32, #tpu.memory_space<vmem>>, vector<1x128xf32>,
    return
  }
}

</mosaic_0001>

<bundles_post_ra>
// kernel: vopce_forward.1
= control target key start
LH: loop header
LB: loop body
LE: loop exit
PB: predicated region body
PF: predicated region fallthrough
CT: control target
= control target key end

     0   :  { %14 = vsyncpa [#allocation7], 0  ;;  %s3524_s30 = smov [#allocation6]   ;;  %s3907_s0 = inlined_call_operand.vmem [shape: f32[8,3], index: 0, kind: input, shape index: {}]   ;;  %s3908_s1 = inlined_call_operand.vmem [shape: bf16[2,3,256], index: 1, kind: input, shape index: {}]   ;;  %s3909_s2 = inlined_call_operand.hbm [shape: bf16[5,256,256], index: 2, kind: input, shape index: {}]   ;;  %s3910_s3 = inlined_call_operand.vmem [shape: bf16[256,32], index: 3, kind: input, shape index: {}]   ;;  %s3911_s4 = inlined_call_operand.vmem [shape: f32[5,256], index: 4, kind: input, shape index: {}]   ;;  %s3912_s5 = inlined_call_operand.vmem [shape: bf16[32,1024], index: 5, kind: input, shape index: {}]   ;;  %s3913_s6 = inlined_call_operand.hbm [shape: bf16[256,1280], index: 6, kind: input, shape index: {}]   ;;  %s3914_s7 = inlined_call_operand.hbm [shape: bf16[1024,128], index: 7, kind: input, shape index: {}]   ;;  %s3915_s8 = inlined_call_operand.vmem [shape: f32[3,1024], index: 8, kind: input, shape index: {}]   ;;  %s3916_s9 = inlined_call_operand.vmem [shape: f32[1,128], index: 9, kind: output, shape index: {}]  }
   0x1   :  { %s24_s10 = sshll.u32 %s3524_s30, 4  ;;  %s3472_s13 = scalar_lea.hbm %s3909_s2, 20480  ;;  %s25_s10 = int_to_ptr.vmem [resolvable:$true] %s24_s10 }
   0x2   :  { %p3473_p0 = scmp.ne.s32.totalorder %s3909_s2, %s3472_s13  ;;  %p3476_p1 = scmp.lt.u32.totalorder %s3472_s13, %s3909_s2 }
   0x4   :  { %p3478_p2 = pnand %p3476_p1, %p3473_p0 }
   0x6   :  { %3481 = shalt.err (!%p3478_p2)
}
   0x7   :  { %s3482_s18 = scalar_lea.vmem %s25_s10, 20480  ;;  %p3487_p4 = scmp.lt.s32.totalorder %s25_s10, %s25_s10 }
   0x8   :  { %p3483_p3 = scmp.ne.s32.totalorder %s25_s10, %s3482_s18  ;;  %p3488_p5 = scmp.lt.s32.totalorder %s3482_s18, %s3482_s18 }
   0xa   :  { %p3489_p6 = por %p3488_p5, %p3487_p4 }
   0xc   :  { %p3490_p7 = pnand %p3489_p6, %p3483_p3 }
   0xe   :  { %3493 = shalt.err (!%p3490_p7)
}
   0xf   :  { %s3525_s19 = smov 128   ;;  %s3526_s20 = smov 8  }
  0x10   :  { %30 = dma.hbm_to_vmem [thread:$0]  %s3909_s2, 20480, %s25_s10, [#allocation7], %s3525_s19, %s3525_s19, %s3526_s20  }
  0x11   :  { %3516 = dma.done.wait [#allocation7], 20480  }
  0x12   :  { %3517 = vsyncadd [#allocation7], 4294946816  ;;  %v58_v0 = vld [vmem:[%s3912_s5] sm:$0xf]  ;;  %v62_v2 = vld [vmem:[%s3912_s5 + $0x4] sm:$0xf] }
  0x13   :  { %v60_v1 = vld [vmem:[%s3912_s5 + $0x20] sm:$0xf]  ;;  %59 = vst [vmem:[#allocation2] sm:$0xf] %v58_v0  ;;  %63 = vst [vmem:[#allocation2 + $0x8] sm:$0xf] %v62_v2 }
  0x14   :  { %61 = vst [vmem:[#allocation2 + $0x4] sm:$0xf] %v60_v1  ;;  %v64_v3 = vld [vmem:[%s3912_s5 + $0x24] sm:$0xf]  ;;  %v66_v4 = vld [vmem:[%s3912_s5 + $0x8] sm:$0xf] }
  0x15   :  { %v68_v5 = vld [vmem:[%s3912_s5 + $0x28] sm:$0xf]  ;;  %65 = vst [vmem:[#allocation2 + $0xc] sm:$0xf] %v64_v3  ;;  %67 = vst [vmem:[#allocation2 + $0x10] sm:$0xf] %v66_v4 }
  0x16   :  { %69 = vst [vmem:[#allocation2 + $0x14] sm:$0xf] %v68_v5  ;;  %v70_v6 = vld [vmem:[%s3912_s5 + $0xc] sm:$0xf]  ;;  %v74_v8 = vld [vmem:[%s3912_s5 + $0x10] sm:$0xf] }
  0x17   :  { %v72_v7 = vld [vmem:[%s3912_s5 + $0x2c] sm:$0xf]  ;;  %71 = vst [vmem:[#allocation2 + $0x18] sm:$0xf] %v70_v6  ;;  %75 = vst [vmem:[#allocation2 + $0x20] sm:$0xf] %v74_v8 }
  0x18   :  { %73 = vst [vmem:[#allocation2 + $0x1c] sm:$0xf] %v72_v7  ;;  %v76_v9 = vld [vmem:[%s3912_s5 + $0x30] sm:$0xf]  ;;  %v78_v10 = vld [vmem:[%s3912_s5 + $0x14] sm:$0xf] }
  0x19   :  { %v80_v11 = vld [vmem:[%s3912_s5 + $0x34] sm:$0xf]  ;;  %77 = vst [vmem:[#allocation2 + $0x24] sm:$0xf] %v76_v9  ;;  %79 = vst [vmem:[#allocation2 + $0x28] sm:$0xf] %v78_v10 }
  0x1a   :  { %81 = vst [vmem:[#allocation2 + $0x2c] sm:$0xf] %v80_v11  ;;  %v82_v12 = vld [vmem:[%s3912_s5 + $0x18] sm:$0xf]  ;;  %v86_v14 = vld [vmem:[%s3912_s5 + $0x1c] sm:$0xf] }
  0x1b   :  { %v84_v13 = vld [vmem:[%s3912_s5 + $0x38] sm:$0xf]  ;;  %83 = vst [vmem:[#allocation2 + $0x30] sm:$0xf] %v82_v12  ;;  %87 = vst [vmem:[#allocation2 + $0x38] sm:$0xf] %v86_v14 }
  0x1c   :  { %85 = vst [vmem:[#allocation2 + $0x34] sm:$0xf] %v84_v13  ;;  %v88_v15 = vld [vmem:[%s3912_s5 + $0x3c] sm:$0xff]   ;;  %v94_v17 = vld [vmem:[%s3912_s5 + $0x44] sm:$0xf] }
  0x1d   :  { %v92_v16 = vld [vmem:[%s3912_s5 + $0x60] sm:$0xf]  ;;  %89 = vst [vmem:[#allocation2 + $0x3c] sm:$0xff] %v88_v15   ;;  %95 = vst [vmem:[#allocation2 + $0x48] sm:$0xf] %v94_v17 }
  0x1e   :  { %93 = vst [vmem:[#allocation2 + $0x44] sm:$0xf] %v92_v16  ;;  %v96_v18 = vld [vmem:[%s3912_s5 + $0x64] sm:$0xf]  ;;  %v98_v19 = vld [vmem:[%s3912_s5 + $0x48] sm:$0xf] }
  0x1f   :  { %v100_v20 = vld [vmem:[%s3912_s5 + $0x68] sm:$0xf]  ;;  %97 = vst [vmem:[#allocation2 + $0x4c] sm:$0xf] %v96_v18  ;;  %99 = vst [vmem:[#allocation2 + $0x50] sm:$0xf] %v98_v19 }
  0x20   :  { %101 = vst [vmem:[#allocation2 + $0x54] sm:$0xf] %v100_v20  ;;  %v102_v21 = vld [vmem:[%s3912_s5 + $0x4c] sm:$0xf]  ;;  %v106_v23 = vld [vmem:[%s3912_s5 + $0x50] sm:$0xf] }
  0x21   :  { %v104_v22 = vld [vmem:[%s3912_s5 + $0x6c] sm:$0xf]  ;;  %103 = vst [vmem:[#allocation2 + $0x58] sm:$0xf] %v102_v21  ;;  %107 = vst [vmem:[#allocation2 + $0x60] sm:$0xf] %v106_v23 }
  0x22   :  { %105 = vst [vmem:[#allocation2 + $0x5c] sm:$0xf] %v104_v22  ;;  %v108_v24 = vld [vmem:[%s3912_s5 + $0x70] sm:$0xf]  ;;  %v110_v25 = vld [vmem:[%s3912_s5 + $0x54] sm:$0xf] }
  0x23   :  { %v112_v26 = vld [vmem:[%s3912_s5 + $0x74] sm:$0xf]  ;;  %109 = vst [vmem:[#allocation2 + $0x64] sm:$0xf] %v108_v24  ;;  %111 = vst [vmem:[#allocation2 + $0x68] sm:$0xf] %v110_v25 }
  0x24   :  { %113 = vst [vmem:[#allocation2 + $0x6c] sm:$0xf] %v112_v26  ;;  %v114_v27 = vld [vmem:[%s3912_s5 + $0x58] sm:$0xf]  ;;  %v118_v29 = vld [vmem:[%s3912_s5 + $0x5c] sm:$0xf] }
  0x25   :  { %v116_v28 = vld [vmem:[%s3912_s5 + $0x78] sm:$0xf]  ;;  %115 = vst [vmem:[#allocation2 + $0x70] sm:$0xf] %v114_v27  ;;  %119 = vst [vmem:[#allocation2 + $0x78] sm:$0xf] %v118_v29 }
  0x26   :  { %117 = vst [vmem:[#allocation2 + $0x74] sm:$0xf] %v116_v28  ;;  %v120_v30 = vld [vmem:[%s3912_s5 + $0x7c] sm:$0xf] }
  0x27   :  { %121 = vst [vmem:[#allocation2 + $0x7c] sm:$0xf] %v120_v30 }
  0x28   :  { %216 = vsyncadd [#allocation5], 2048  ;;  %s222_s22 = sld [smem:[#allocation0]]   ;;  %s3527_s23 = smov [#allocation3]   ;;  %v3529_v31 = vmov 0   ;;  %vm304_vm0 = vcmask 1040384  }
  0x29   :  { %s230_s24 = sshll.u32 %s3527_s23, 4  ;;  %s3528_s25 = smov 1280   ;;  %346 = vmatprep.mubr.bf16.mxu0 %v3529_v31  ;;  %406 = vmatprep.mubr.bf16.mxu1 %v3529_v31  ;;  %vm305_vm1 = vcmask 1041408   ;;  %v3537_v32 = vmov 65535   ;;  %vm270_vm2 = vcmask 23552   ;;  %s231_s24 = int_to_ptr.vmem [resolvable:$true] %s230_s24 }
  0x2a   :  { %234 = sst [smem:[#allocation10]] %s3528_s25  ;;  %s3530_s26 = smov 10   ;;  %v306_v33 = vsel %vm304_vm0, 4294967295, %v3537_v32 }
  0x2b   :  { %236 = sst [smem:[#allocation10 + $0x1]] %s3528_s25  ;;  %s3531_s27 = smov 64   ;;  %v307_v34 = vsel %vm305_vm1, %v306_v33, 0 }
  0x2c   :  { %238 = sst [smem:[#allocation10 + $0x2]] %s3530_s26  ;;  %s3532_s29 = smov 2  }
  0x2d   :  { %240 = sst [smem:[#allocation10 + $0x3]] %s3531_s27  ;;  %s3533_s30 = smov 640  }
  0x2e   :  { %s2874_s28 = sshll.u32 %s222_s22, 26  ;;  %242 = sst [smem:[#allocation10 + $0x4]] %s3525_s19 }
  0x2f   :  { %s2875_s5 = sadd.s32 134217728, %s2874_s28  ;;  %244 = sst [smem:[#allocation10 + $0x5]] %s3532_s29 }
  0x30   :  { %248 = sst [smem:[#allocation10 + $0x7]] %s3531_s27  ;;  %s3534_s2 = smov 4  }
  0x31   :  { %246 = sst [smem:[#allocation10 + $0x6]] %s3533_s30  ;;  %s3535_s10 = smov [#allocation5 + $0x1]  }
  0x32   :  { %250 = sst [smem:[#allocation10 + $0x8]] %s3534_s2  ;;  %s3536_s11 = smov [#allocation9]  }
  0x33   :  { %252 = dma.general %s3913_s6, 20480, %s231_s24, %s3535_s10, %s3536_s11, [#allocation10], %s2875_s5, 0  }
  0x34   :  { %v2877_v35 = vld.sshfl [vmem:[%s3908_s1] sm:$0x33 pattern:$0x76325410]  ;;  %v3196_v45 = vld [vmem:[#allocation6 + $0x4] ss:$8 sps:$4 sm:$0xff]  }
  0x35   :  { %v265_v36 = vld [vmem:[%s3907_s0] sm:$0xff]  ;;  %v300_v37 = vcombine.high %v2877_v35, %v2877_v35  ;;  %v309_v40 = vand.u32 %v2877_v35, %v307_v34  ;;  %v3199_v51 = vld [vmem:[#allocation6 + $0x14] ss:$8 sps:$4 sm:$0xff]   ;;  %v3197_v55 = vld [vmem:[#allocation6 + $0x10] ss:$8 sps:$4 sm:$0xff]   ;;  %s3494_s11 = scalar_lea.hbm %s3914_s7, 8192 }
  0x36   :  { %v2879_v38 = vld.sshfl [vmem:[%s3908_s1 + $0x4] sm:$0x33 pattern:$0x76325410]  ;;  %v271_v39 = vsel %vm270_vm2, %v265_v36, 0.0  ;;  %v280_v48 = vpack.c.bf16 %v265_v36, %v265_v36  ;;  %p3495_p8 = scmp.ne.s32.totalorder %s3914_s7, %s3494_s11  ;;  %p3498_p9 = scmp.lt.u32.totalorder %s3494_s11, %s3914_s7 }
  0x37   :  { %v364_v41 = vcombine.high %v2879_v38, %v2879_v38  ;;  %v272_v42 = vrot.slane %v271_v39, 4  ;;  %v312_v43 = vand.u32 %v307_v34, %v300_v37  ;;  %v369_v44 = vand.u32 %v2879_v38, %v307_v34  ;;  %v3194_v50 = vld [vmem:[#allocation6] ss:$8 sps:$4 sm:$0xff]   ;;  %v3208_v52 = vld [vmem:[#allocation6 + $0x104] ss:$8 sps:$4 sm:$0xff]  }
  0x38   :  { %v3202_v56 = vld [vmem:[#allocation6 + $0x24] ss:$8 sps:$4 sm:$0xff]   ;;  %v3200_v59 = vld [vmem:[#allocation6 + $0x20] ss:$8 sps:$4 sm:$0xff]   ;;  %v3205_v60 = vld [vmem:[#allocation6 + $0x34] ss:$8 sps:$4 sm:$0xff]   ;;  %p3500_p10 = pnand %p3498_p9, %p3495_p8 }
  0x39   :  { %v372_v46 = vand.u32 %v364_v41, %v307_v34  ;;  %v273_v47 = vadd.f32 %v272_v42, %v271_v39  ;;  %314 = vmatprep.subr.bf16.mxu0 %v312_v43  ;;  %v3206_v61 = vld [vmem:[#allocation6 + $0x100] ss:$8 sps:$4 sm:$0xff]   ;;  %v3214_v63 = vld [vmem:[#allocation6 + $0x114] ss:$8 sps:$4 sm:$0xff]   ;;  %v3203_v0 = vld [vmem:[#allocation6 + $0x30] ss:$8 sps:$4 sm:$0xff]  }
  0x3a   :  { %315 = vmatpush1.bf16.msra.mxu0 %v309_v40  ;;  %v3211_v1 = vld [vmem:[#allocation6 + $0x44] ss:$8 sps:$4 sm:$0xff]   ;;  %v3212_v2 = vld [vmem:[#allocation6 + $0x110] ss:$8 sps:$4 sm:$0xff]   ;;  %v3209_v4 = vld [vmem:[#allocation6 + $0x40] ss:$8 sps:$4 sm:$0xff]  }
  0x3b   :  { %374 = vmatprep.subr.bf16.mxu1 %v372_v46  ;;  %v274_v49 = vrot.slane %v273_v47, 2  ;;  %681 = vmatprep.subr.bf16.mxu0 %v3196_v45  ;;  %v3220_v3 = vld [vmem:[#allocation6 + $0x124] ss:$8 sps:$4 sm:$0xff]   ;;  %v3217_v5 = vld [vmem:[#allocation6 + $0x54] ss:$8 sps:$4 sm:$0xff]  }
  0x3c   :  { %375 = vmatpush1.bf16.msra.mxu1 %v369_v44  ;;  %v3218_v6 = vld [vmem:[#allocation6 + $0x120] ss:$8 sps:$4 sm:$0xff]   ;;  %v3215_v7 = vld [vmem:[#allocation6 + $0x50] ss:$8 sps:$4 sm:$0xff]   ;;  %v3226_v8 = vld [vmem:[#allocation6 + $0x134] ss:$8 sps:$4 sm:$0xff]  }
  0x3d   :  { %v275_v53 = vadd.f32 %v274_v49, %v273_v47  ;;  %2878 = vmatmul.mubr.msk.bf16.vlgmr.msra.gmra.mrb[0].mxu0 %vm270_vm2, %v280_v48  ;;  %884 = vmatprep.subr.bf16.mxu1 %v3208_v52  ;;  %v3223_v9 = vld [vmem:[#allocation6 + $0x64] ss:$8 sps:$4 sm:$0xff]   ;;  %v3224_v10 = vld [vmem:[#allocation6 + $0x130] ss:$8 sps:$4 sm:$0xff]   ;;  %v3221_v12 = vld [vmem:[#allocation6 + $0x60] ss:$8 sps:$4 sm:$0xff]  }
  0x3e   :  { %682 = vmatpush1.bf16.msra.mxu0 %v3194_v50  ;;  %v3232_v11 = vld [vmem:[#allocation6 + $0x144] ss:$8 sps:$4 sm:$0xff]   ;;  %v3229_v13 = vld [vmem:[#allocation6 + $0x74] ss:$8 sps:$4 sm:$0xff]   ;;  %v3230_v14 = vld [vmem:[#allocation6 + $0x140] ss:$8 sps:$4 sm:$0xff]  }
  0x3f   :  { %v276_v54 = vrot.slane %v275_v53, 1  ;;  %683 = vmatprep.subr.bf16.mxu0 %v3199_v51  ;;  %v3238_v15 = vld [vmem:[#allocation6 + $0x154] ss:$8 sps:$4 sm:$0xff]   ;;  %v3227_v16 = vld [vmem:[#allocation6 + $0x70] ss:$8 sps:$4 sm:$0xff]  }
  0x40   :  { %v3235_v17 = vld [vmem:[#allocation6 + $0x84] ss:$8 sps:$4 sm:$0xff]   ;;  %v3236_v18 = vld [vmem:[#allocation6 + $0x150] ss:$8 sps:$4 sm:$0xff]   ;;  %v3233_v20 = vld [vmem:[#allocation6 + $0x80] ss:$8 sps:$4 sm:$0xff]  }
  0x41   :  { %v277_v57 = vadd.f32 %v276_v54, %v275_v53  ;;  %v3244_v19 = vld [vmem:[#allocation6 + $0x164] ss:$8 sps:$4 sm:$0xff]   ;;  %v3241_v21 = vld [vmem:[#allocation6 + $0x94] ss:$8 sps:$4 sm:$0xff]   ;;  %v3242_v22 = vld [vmem:[#allocation6 + $0x160] ss:$8 sps:$4 sm:$0xff]  }
  0x42   :  { %684 = vmatpush1.bf16.msra.mxu0 %v3197_v55  ;;  %v3239_v23 = vld [vmem:[#allocation6 + $0x90] ss:$8 sps:$4 sm:$0xff]   ;;  %v3247_v24 = vld [vmem:[#allocation6 + $0xa4] ss:$8 sps:$4 sm:$0xff]   ;;  %v3245_v25 = vld [vmem:[#allocation6 + $0xa0] ss:$8 sps:$4 sm:$0xff]  }
  0x43   :  { %v279_v58 = vmul.f32 0.125, %v277_v57  ;;  %685 = vmatprep.subr.bf16.mxu0 %v3202_v56  ;;  %v3248_v26 = vld [vmem:[#allocation6 + $0x170] ss:$8 sps:$4 sm:$0xff]   ;;  %v3250_v27 = vld [vmem:[#allocation6 + $0x174] ss:$8 sps:$4 sm:$0xff]   ;;  %v282_v57 = vlaneseq }
  0x44   :  { %v3253_v28 = vld [vmem:[#allocation6 + $0xb4] ss:$8 sps:$4 sm:$0xff]   ;;  %v3251_v29 = vld [vmem:[#allocation6 + $0xb0] ss:$8 sps:$4 sm:$0xff]   ;;  %v3256_v30 = vld [vmem:[#allocation6 + $0x184] ss:$8 sps:$4 sm:$0xff]  }
  0x45   :  { %v355_v62 = vpack.c.bf16 %v279_v58, %v279_v58  ;;  %v3254_v32 = vld [vmem:[#allocation6 + $0x180] ss:$8 sps:$4 sm:$0xff]   ;;  %v3259_v33 = vld [vmem:[#allocation6 + $0xc4] ss:$8 sps:$4 sm:$0xff]   ;;  %v3262_v35 = vld [vmem:[#allocation6 + $0x194] ss:$8 sps:$4 sm:$0xff]  }
  0x46   :  { %686 = vmatpush1.bf16.msra.mxu0 %v3200_v59  ;;  %v3257_v34 = vld [vmem:[#allocation6 + $0xc0] ss:$8 sps:$4 sm:$0xff]   ;;  %v3260_v36 = vld [vmem:[#allocation6 + $0x190] ss:$8 sps:$4 sm:$0xff]   ;;  %v3265_v38 = vld [vmem:[#allocation6 + $0xd4] ss:$8 sps:$4 sm:$0xff]  }
  0x47   :  { %2880 = vmatmul.mubr.msk.bf16.vlgmr.msra.gmra.mrb[0].mxu1 %vm270_vm2, %v355_v62  ;;  %687 = vmatprep.subr.bf16.mxu0 %v3205_v60  ;;  %v3263_v37 = vld [vmem:[#allocation6 + $0xd0] ss:$8 sps:$4 sm:$0xff]   ;;  %v3266_v39 = vld [vmem:[#allocation6 + $0x1a0] ss:$8 sps:$4 sm:$0xff]   ;;  %v3268_v40 = vld [vmem:[#allocation6 + $0x1a4] ss:$8 sps:$4 sm:$0xff]  }
  0x48   :  { %885 = vmatpush1.bf16.msra.mxu1 %v3206_v61  ;;  %v3271_v41 = vld [vmem:[#allocation6 + $0xe4] ss:$8 sps:$4 sm:$0xff]   ;;  %v3274_v42 = vld [vmem:[#allocation6 + $0x1b4] ss:$8 sps:$4 sm:$0xff]   ;;  %v3269_v43 = vld [vmem:[#allocation6 + $0xe0] ss:$8 sps:$4 sm:$0xff]  }
  0x49   :  { %886 = vmatprep.subr.bf16.mxu1 %v3214_v63  ;;  %v3277_v44 = vld [vmem:[#allocation6 + $0xf4] ss:$8 sps:$4 sm:$0xff]   ;;  %v3272_v45 = vld [vmem:[#allocation6 + $0x1b0] ss:$8 sps:$4 sm:$0xff]   ;;  %v3280_v46 = vld [vmem:[#allocation6 + $0x1c4] ss:$8 sps:$4 sm:$0xff]  }
  0x4a   :  { %688 = vmatpush1.bf16.msra.mxu0 %v3203_v0  ;;  %v3275_v47 = vld [vmem:[#allocation6 + $0xf0] ss:$8 sps:$4 sm:$0xff]   ;;  %v3278_v48 = vld [vmem:[#allocation6 + $0x1c0] ss:$8 sps:$4 sm:$0xff]   ;;  %v3283_v50 = vld [vmem:[#allocation6 + $0x1d4] ss:$8 sps:$4 sm:$0xff]  }
  0x4b   :  { %689 = vmatprep.subr.bf16.mxu0 %v3211_v1  ;;  %v3281_v49 = vld [vmem:[#allocation6 + $0x1d0] ss:$8 sps:$4 sm:$0xff]   ;;  %v3286_v51 = vld [vmem:[#allocation6 + $0x1e4] ss:$8 sps:$4 sm:$0xff]   ;;  %v3284_v52 = vld [vmem:[#allocation6 + $0x1e0] ss:$8 sps:$4 sm:$0xff]  }
  0x4c   :  { %887 = vmatpush1.bf16.msra.mxu1 %v3212_v2  ;;  %v3289_v53 = vld [vmem:[#allocation6 + $0x1f4] ss:$8 sps:$4 sm:$0xff]   ;;  %v3287_v54 = vld [vmem:[#allocation6 + $0x1f0] ss:$8 sps:$4 sm:$0xff]   ;;  %v3292_v55 = vld [vmem:[#allocation6 + $0x204] ss:$8 sps:$4 sm:$0xff]  }
  0x4d   :  { %888 = vmatprep.subr.bf16.mxu1 %v3220_v3  ;;  %v3304_v56 = vld [vmem:[#allocation6 + $0x304] ss:$8 sps:$4 sm:$0xff]   ;;  %v3716_v58 = vshrl.u32 %v282_v57, 7  ;;  %v269_v61 = vld [vmem:[%s3911_s4] ss:$8 sm:$0x3] }
  0x4e   :  { %690 = vmatpush1.bf16.msra.mxu0 %v3209_v4 }
  0x4f   :  { %691 = vmatprep.subr.bf16.mxu0 %v3217_v5  ;;  %v3719_v59 = vsub.s32 0, %v3716_v58  ;;  %v3725_v62 = vsub.s32 1, %v3716_v58 }
  0x50   :  { %889 = vmatpush1.bf16.msra.mxu1 %v3218_v6 }
  0x51   :  { %890 = vmatprep.subr.bf16.mxu1 %v3226_v8  ;;  %v285_v2 = vrot.slane %v269_v61, %v3719_v59  ;;  %v289_v3 = vrot.slane %v269_v61, %v3725_v62  ;;  %v3326_v61 = vld [vmem:[#allocation6 + $0x340] ss:$8 sps:$4 sm:$0xff]  }
  0x52   :  { %692 = vmatpush1.bf16.msra.mxu0 %v3215_v7 }
  0x53   :  { %693 = vmatprep.subr.bf16.mxu0 %v3223_v9 }
  0x54   :  { %891 = vmatpush1.bf16.msra.mxu1 %v3224_v10 }
  0x55   :  { %892 = vmatprep.subr.bf16.mxu1 %v3232_v11 }
  0x56   :  { %694 = vmatpush1.bf16.msra.mxu0 %v3221_v12 }
  0x57   :  { %695 = vmatprep.subr.bf16.mxu0 %v3229_v13 }
  0x58   :  { %893 = vmatpush1.bf16.msra.mxu1 %v3230_v14 }
  0x59   :  { %894 = vmatprep.subr.bf16.mxu1 %v3238_v15 }
  0x5a   :  { %696 = vmatpush1.bf16.msra.mxu0 %v3227_v16 }
  0x5b   :  { %697 = vmatprep.subr.bf16.mxu0 %v3235_v17 }
  0x5c   :  { %895 = vmatpush1.bf16.msra.mxu1 %v3236_v18 }
  0x5d   :  { %896 = vmatprep.subr.bf16.mxu1 %v3244_v19  ;;  %v3290_v19 = vld [vmem:[#allocation6 + $0x200] ss:$8 sps:$4 sm:$0xff]  }
  0x5e   :  { %698 = vmatpush1.bf16.msra.mxu0 %v3233_v20 }
  0x5f   :  { %699 = vmatprep.subr.bf16.mxu0 %v3241_v21 }
  0x60   :  { %897 = vmatpush1.bf16.msra.mxu1 %v3242_v22  ;;  %v3295_v22 = vld [vmem:[#allocation6 + $0x214] ss:$8 sps:$4 sm:$0xff]  }
  0x61   :  { %898 = vmatprep.subr.bf16.mxu1 %v3250_v27 }
  0x62   :  { %700 = vmatpush1.bf16.msra.mxu0 %v3239_v23 }
  0x63   :  { %701 = vmatprep.subr.bf16.mxu0 %v3247_v24 }
  0x64   :  { %899 = vmatpush1.bf16.msra.mxu1 %v3248_v26  ;;  %v3293_v26 = vld [vmem:[#allocation6 + $0x210] ss:$8 sps:$4 sm:$0xff]  }
  0x65   :  { %900 = vmatprep.subr.bf16.mxu1 %v3256_v30 }
  0x66   :  { %702 = vmatpush1.bf16.msra.mxu0 %v3245_v25 }
  0x67   :  { %703 = vmatprep.subr.bf16.mxu0 %v3253_v28  ;;  %v3298_v28 = vld [vmem:[#allocation6 + $0x224] ss:$8 sps:$4 sm:$0xff]  }
  0x68   :  { %901 = vmatpush1.bf16.msra.mxu1 %v3254_v32 }
  0x69   :  { %902 = vmatprep.subr.bf16.mxu1 %v3262_v35  ;;  %v3301_v35 = vld [vmem:[#allocation6 + $0x234] ss:$8 sps:$4 sm:$0xff]  }
  0x6a   :  { %704 = vmatpush1.bf16.msra.mxu0 %v3251_v29 }
  0x6b   :  { %705 = vmatprep.subr.bf16.mxu0 %v3259_v33  ;;  %v3296_v33 = vld [vmem:[#allocation6 + $0x220] ss:$8 sps:$4 sm:$0xff]  }
  0x6c   :  { %903 = vmatpush1.bf16.msra.mxu1 %v3260_v36 }
  0x6d   :  { %904 = vmatprep.subr.bf16.mxu1 %v3268_v40  ;;  %v3307_v40 = vld [vmem:[#allocation6 + $0x244] ss:$8 sps:$4 sm:$0xff]  }
  0x6e   :  { %706 = vmatpush1.bf16.msra.mxu0 %v3257_v34 }
  0x6f   :  { %707 = vmatprep.subr.bf16.mxu0 %v3265_v38 }
  0x70   :  { %905 = vmatpush1.bf16.msra.mxu1 %v3266_v39  ;;  %v3299_v39 = vld [vmem:[#allocation6 + $0x230] ss:$8 sps:$4 sm:$0xff]  }
  0x71   :  { %906 = vmatprep.subr.bf16.mxu1 %v3274_v42  ;;  %v3302_v42 = vld [vmem:[#allocation6 + $0x300] ss:$8 sps:$4 sm:$0xff]  }
  0x72   :  { %708 = vmatpush1.bf16.msra.mxu0 %v3263_v37 }
  0x73   :  { %709 = vmatprep.subr.bf16.mxu0 %v3271_v41 }
  0x74   :  { %907 = vmatpush1.bf16.msra.mxu1 %v3272_v45  ;;  %v3305_v45 = vld [vmem:[#allocation6 + $0x240] ss:$8 sps:$4 sm:$0xff]  }
  0x75   :  { %908 = vmatprep.subr.bf16.mxu1 %v3280_v46  ;;  %v3313_v46 = vld [vmem:[#allocation6 + $0x254] ss:$8 sps:$4 sm:$0xff]  }
  0x76   :  { %710 = vmatpush1.bf16.msra.mxu0 %v3269_v43 }
  0x77   :  { %711 = vmatprep.subr.bf16.mxu0 %v3277_v44  ;;  %v3310_v44 = vld [vmem:[#allocation6 + $0x314] ss:$8 sps:$4 sm:$0xff]  }
  0x78   :  { %909 = vmatpush1.bf16.msra.mxu1 %v3278_v48  ;;  %v3316_v48 = vld [vmem:[#allocation6 + $0x324] ss:$8 sps:$4 sm:$0xff]  }
  0x79   :  { %910 = vmatprep.subr.bf16.mxu1 %v3283_v50  ;;  %v3319_v50 = vld [vmem:[#allocation6 + $0x264] ss:$8 sps:$4 sm:$0xff]  }
  0x7a   :  { %712 = vmatpush1.bf16.msra.mxu0 %v3275_v47  ;;  %v3308_v47 = vld [vmem:[#allocation6 + $0x310] ss:$8 sps:$4 sm:$0xff]  }
  0x7b   :  { %1192 = vmatprep.subr.bf16.mxu0 %v3292_v55  ;;  %v3320_v55 = vld [vmem:[#allocation6 + $0x330] ss:$8 sps:$4 sm:$0xff]  }
  0x7c   :  { %911 = vmatpush1.bf16.msra.mxu1 %v3281_v49  ;;  %v3311_v49 = vld [vmem:[#allocation6 + $0x250] ss:$8 sps:$4 sm:$0xff]  }
  0x7d   :  { %912 = vmatprep.subr.bf16.mxu1 %v3286_v51  ;;  %v3314_v51 = vld [vmem:[#allocation6 + $0x320] ss:$8 sps:$4 sm:$0xff]  }
  0x80   :  { %913 = vmatpush1.bf16.msra.mxu1 %v3284_v52  ;;  %v3322_v52 = vld [vmem:[#allocation6 + $0x334] ss:$8 sps:$4 sm:$0xff]  }
  0x81   :  { %914 = vmatprep.subr.bf16.mxu1 %v3289_v53  ;;  %v3317_v53 = vld [vmem:[#allocation6 + $0x260] ss:$8 sps:$4 sm:$0xff]  }
  0x84   :  { %915 = vmatpush1.bf16.msra.mxu1 %v3287_v54  ;;  %v3325_v54 = vld [vmem:[#allocation6 + $0x274] ss:$8 sps:$4 sm:$0xff]  }
  0x85   :  { %1395 = vmatprep.subr.bf16.mxu1 %v3304_v56  ;;  %v3323_v56 = vld [vmem:[#allocation6 + $0x270] ss:$8 sps:$4 sm:$0xff]  }
 0x110   :  { %v348_v60 = vpop.f32.mrb[0].mxu0 }
 0x111   :  { %v350_v63 = vpop.f32.mrb[1].mxu0  ;;  %v349_v4 = vadd.f32 %v348_v60, %v285_v2  ;;  %v3328_v60 = vld [vmem:[#allocation6 + $0x344] ss:$8 sps:$4 sm:$0xff]   ;;  %v3332_v2 = vld [vmem:[#allocation6 + $0x350] ss:$8 sps:$4 sm:$0xff]  }
 0x112   :  { %v352_v0 = vpop.f32.mrb[2].mxu0  ;;  %v351_v5 = vadd.f32 %v350_v63, %v289_v3  ;;  %v3331_v63 = vld [vmem:[#allocation6 + $0x284] ss:$8 sps:$4 sm:$0xff]   ;;  %v3335_v3 = vld [vmem:[#allocation6 + $0x290] ss:$8 sps:$4 sm:$0xff]  }
 0x113   :  { %v353_v1 = vpop.f32.mrb[3].mxu0  ;;  %v3329_v0 = vld [vmem:[#allocation6 + $0x280] ss:$8 sps:$4 sm:$0xff]  }
 0x114   :  { %v3334_v1 = vld [vmem:[#allocation6 + $0x354] ss:$8 sps:$4 sm:$0xff]  }
 0x11a   :  { %v408_v6 = vpop.f32.mrb[0].mxu1 }
 0x11b   :  { %v418_v7 = vrot.slane %v408_v6, %v3719_v59  ;;  %v410_v8 = vpop.f32.mrb[1].mxu1  ;;  %v3338_v6 = vld [vmem:[#allocation6 + $0x360] ss:$8 sps:$4 sm:$0xff]  }
 0x11c   :  { %v422_v9 = vrot.slane %v410_v8, %v3719_v59  ;;  %v412_v10 = vpop.f32.mrb[2].mxu1  ;;  %v3346_v8 = vld [vmem:[#allocation6 + $0x374] ss:$8 sps:$4 sm:$0xff]  }
 0x11d   :  { %v423_v11 = vsub.f32 %v349_v4, %v418_v7  ;;  %v413_v12 = vpop.f32.mrb[3].mxu1  ;;  %v3337_v4 = vld [vmem:[#allocation6 + $0x294] ss:$8 sps:$4 sm:$0xff]   ;;  %v3343_v7 = vld [vmem:[#allocation6 + $0x2a4] ss:$8 sps:$4 sm:$0xff]  }
 0x11e   :  { %v424_v13 = vsub.f32 %v351_v5, %v422_v9  ;;  %v3340_v5 = vld [vmem:[#allocation6 + $0x364] ss:$8 sps:$4 sm:$0xff]   ;;  %v3341_v9 = vld [vmem:[#allocation6 + $0x2a0] ss:$8 sps:$4 sm:$0xff]   ;;  %v3344_v10 = vld [vmem:[#allocation6 + $0x370] ss:$8 sps:$4 sm:$0xff]  }
 0x11f   :  { %3450 = vtanh.f32 %v423_v11  ;;  %v3349_v11 = vld [vmem:[#allocation6 + $0x2b4] ss:$8 sps:$4 sm:$0xff]   ;;  %v3347_v12 = vld [vmem:[#allocation6 + $0x2b0] ss:$8 sps:$4 sm:$0xff]  }
 0x120   :  { %3452 = vtanh.f32 %v424_v13  ;;  %v3352_v13 = vld [vmem:[#allocation6 + $0x384] ss:$8 sps:$4 sm:$0xff]  }
 0x129   :  { %v3451_v14 = vpop.eup %3450 }
 0x12a   :  { %v3453_v15 = vpop.eup %3452  ;;  %v494_v16 = vrot.slane %v3451_v14, 4  ;;  %v508_v20 = vpack.c.bf16 %v3451_v14, %v3451_v14 }
 0x12b   :  { %v509_v17 = vpack.c.bf16 %v3453_v15, %v3453_v15  ;;  %v500_v18 = vrot.slane %v3453_v15, 4 }
 0x12c   :  { %v495_v21 = vadd.f32 %v3451_v14, %v494_v16  ;;  %v3350_v14 = vld [vmem:[#allocation6 + $0x380] ss:$8 sps:$4 sm:$0xff]  }
 0x12d   :  { %713 = vmatprep.mubr.bf16.mxu0 %v509_v17  ;;  %v501_v23 = vadd.f32 %v3453_v15, %v500_v18  ;;  %v3355_v15 = vld [vmem:[#allocation6 + $0x2c4] ss:$8 sps:$4 sm:$0xff]   ;;  %v3353_v16 = vld [vmem:[#allocation6 + $0x2c0] ss:$8 sps:$4 sm:$0xff]   ;;  %v3358_v17 = vld [vmem:[#allocation6 + $0x394] ss:$8 sps:$4 sm:$0xff]  }
 0x12e   :  { %714 = vmatmul.mubr.bf16.vlgmr.msra.gmra.mrb[4].mxu0 %v508_v20  ;;  %v496_v24 = vrot.slane %v495_v21, 2  ;;  %v3356_v18 = vld [vmem:[#allocation6 + $0x390] ss:$8 sps:$4 sm:$0xff]   ;;  %v3361_v20 = vld [vmem:[#allocation6 + $0x2d4] ss:$8 sps:$4 sm:$0xff]  }
 0x12f   :  { %v502_v25 = vrot.slane %v501_v23, 2  ;;  %1193 = vmatpush1.bf16.msra.mxu0 %v3290_v19  ;;  %v3359_v19 = vld [vmem:[#allocation6 + $0x2d0] ss:$8 sps:$4 sm:$0xff]  }
 0x130   :  { %v497_v27 = vadd.f32 %v496_v24, %v495_v21  ;;  %1194 = vmatprep.subr.bf16.mxu0 %v3295_v22  ;;  %v3362_v21 = vld [vmem:[#allocation6 + $0x3a0] ss:$8 sps:$4 sm:$0xff]   ;;  %v3364_v22 = vld [vmem:[#allocation6 + $0x3a4] ss:$8 sps:$4 sm:$0xff]   ;;  %v3370_v24 = vld [vmem:[#allocation6 + $0x3b4] ss:$8 sps:$4 sm:$0xff]  }
 0x131   :  { %v503_v29 = vadd.f32 %v502_v25, %v501_v23  ;;  %v3367_v23 = vld [vmem:[#allocation6 + $0x2e4] ss:$8 sps:$4 sm:$0xff]   ;;  %v3365_v25 = vld [vmem:[#allocation6 + $0x2e0] ss:$8 sps:$4 sm:$0xff]  }
 0x132   :  { %v498_v30 = vrot.slane %v497_v27, 1 }
 0x133   :  { %v504_v32 = vrot.slane %v503_v29, 1  ;;  %1195 = vmatpush1.bf16.msra.mxu0 %v3293_v26  ;;  %v3373_v26 = vld [vmem:[#allocation6 + $0x2f4] ss:$8 sps:$4 sm:$0xff]  }
 0x134   :  { %v499_v34 = vadd.f32 %v498_v30, %v497_v27  ;;  %1196 = vmatprep.subr.bf16.mxu0 %v3298_v28  ;;  %v3368_v27 = vld [vmem:[#allocation6 + $0x3b0] ss:$8 sps:$4 sm:$0xff]   ;;  %v3376_v28 = vld [vmem:[#allocation6 + $0x3c4] ss:$8 sps:$4 sm:$0xff]   ;;  %v3374_v30 = vld [vmem:[#allocation6 + $0x3c0] ss:$8 sps:$4 sm:$0xff]  }
 0x135   :  { %v505_v36 = vadd.f32 %v504_v32, %v503_v29  ;;  %v3371_v29 = vld [vmem:[#allocation6 + $0x2f0] ss:$8 sps:$4 sm:$0xff]  }
 0x136   :  { %v506_v37 = vmul.f32 0.125, %v499_v34  ;;  %v3377_v32 = vld [vmem:[#allocation6 + $0x3d0] ss:$8 sps:$4 sm:$0xff]   ;;  %v3382_v34 = vld [vmem:[#allocation6 + $0x3e4] ss:$8 sps:$4 sm:$0xff]  }
 0x137   :  { %v507_v38 = vmul.f32 0.125, %v505_v36  ;;  %1197 = vmatpush1.bf16.msra.mxu0 %v3296_v33  ;;  %v3379_v33 = vld [vmem:[#allocation6 + $0x3d4] ss:$8 sps:$4 sm:$0xff]  }
 0x138   :  { %1198 = vmatprep.subr.bf16.mxu0 %v3301_v35  ;;  %v722_v43 = vpack.c.bf16 %v506_v37, %v506_v37  ;;  %v3380_v35 = vld [vmem:[#allocation6 + $0x3e0] ss:$8 sps:$4 sm:$0xff]   ;;  %v3385_v36 = vld [vmem:[#allocation6 + $0x3f4] ss:$8 sps:$4 sm:$0xff]   ;;  %v3383_v37 = vld [vmem:[#allocation6 + $0x3f0] ss:$8 sps:$4 sm:$0xff]  }
 0x139   :  { %v723_v41 = vpack.c.bf16 %v507_v38, %v507_v38  ;;  %v3388_v38 = vld [vmem:[#allocation6 + $0x404] ss:$8 sps:$4 sm:$0xff]  }
 0x13b   :  { %916 = vmatprep.mubr.bf16.mxu1 %v723_v41  ;;  %1199 = vmatpush1.bf16.msra.mxu0 %v3299_v39 }
 0x13c   :  { %917 = vmatmul.mubr.bf16.vlgmr.msra.gmra.mrb[4].mxu1 %v722_v43  ;;  %1200 = vmatprep.subr.bf16.mxu0 %v3307_v40  ;;  %v2881_v43 = vld [vmem:[%s3911_s4 + $0x1] ss:$8 sm:$0x3] }
 0x13d   :  { %1396 = vmatpush1.bf16.msra.mxu1 %v3302_v42 }
 0x13e   :  { %1397 = vmatprep.subr.bf16.mxu1 %v3310_v44  ;;  %v514_v44 = vrot.slane %v2881_v43, %v3719_v59 }
 0x13f   :  { %1201 = vmatpush1.bf16.msra.mxu0 %v3305_v45  ;;  %v518_v45 = vrot.slane %v2881_v43, %v3725_v62  ;;  %v3425_v43 = vld [vmem:[#allocation6 + $0x4d0] ss:$8 sps:$4 sm:$0xff]  }
 0x140   :  { %1202 = vmatprep.subr.bf16.mxu0 %v3313_v46 }
 0x141   :  { %1398 = vmatpush1.bf16.msra.mxu1 %v3308_v47 }
 0x142   :  { %1399 = vmatprep.subr.bf16.mxu1 %v3316_v48 }
 0x143   :  { %1203 = vmatpush1.bf16.msra.mxu0 %v3311_v49 }
 0x144   :  { %1204 = vmatprep.subr.bf16.mxu0 %v3319_v50 }
 0x145   :  { %1400 = vmatpush1.bf16.msra.mxu1 %v3314_v51 }
 0x146   :  { %1401 = vmatprep.subr.bf16.mxu1 %v3322_v52 }
 0x147   :  { %1205 = vmatpush1.bf16.msra.mxu0 %v3317_v53 }
 0x148   :  { %1206 = vmatprep.subr.bf16.mxu0 %v3325_v54 }
 0x149   :  { %1402 = vmatpush1.bf16.msra.mxu1 %v3320_v55 }
 0x14a   :  { %1403 = vmatprep.subr.bf16.mxu1 %v3328_v60 }
 0x14b   :  { %1207 = vmatpush1.bf16.msra.mxu0 %v3323_v56 }
 0x14c   :  { %1208 = vmatprep.subr.bf16.mxu0 %v3331_v63 }
 0x14d   :  { %1404 = vmatpush1.bf16.msra.mxu1 %v3326_v61 }
 0x14e   :  { %1405 = vmatprep.subr.bf16.mxu1 %v3334_v1  ;;  %v3386_v1 = vld [vmem:[#allocation6 + $0x400] ss:$8 sps:$4 sm:$0xff]  }
 0x14f   :  { %1209 = vmatpush1.bf16.msra.mxu0 %v3329_v0 }
 0x150   :  { %1210 = vmatprep.subr.bf16.mxu0 %v3337_v4  ;;  %v3391_v4 = vld [vmem:[#allocation6 + $0x414] ss:$8 sps:$4 sm:$0xff]  }
 0x151   :  { %1406 = vmatpush1.bf16.msra.mxu1 %v3332_v2 }
 0x152   :  { %1407 = vmatprep.subr.bf16.mxu1 %v3340_v5 }
 0x153   :  { %1211 = vmatpush1.bf16.msra.mxu0 %v3335_v3 }
 0x154   :  { %1212 = vmatprep.subr.bf16.mxu0 %v3343_v7 }
 0x155   :  { %1408 = vmatpush1.bf16.msra.mxu1 %v3338_v6 }
 0x156   :  { %1409 = vmatprep.subr.bf16.mxu1 %v3346_v8  ;;  %v3389_v8 = vld [vmem:[#allocation6 + $0x410] ss:$8 sps:$4 sm:$0xff]  }
 0x157   :  { %1213 = vmatpush1.bf16.msra.mxu0 %v3341_v9 }
 0x158   :  { %1214 = vmatprep.subr.bf16.mxu0 %v3349_v11 }
 0x159   :  { %1410 = vmatpush1.bf16.msra.mxu1 %v3344_v10  ;;  %v3394_v10 = vld [vmem:[#allocation6 + $0x424] ss:$8 sps:$4 sm:$0xff]  }
 0x15a   :  { %1411 = vmatprep.subr.bf16.mxu1 %v3352_v13 }
 0x15b   :  { %1215 = vmatpush1.bf16.msra.mxu0 %v3347_v12 }
 0x15c   :  { %1216 = vmatprep.subr.bf16.mxu0 %v3355_v15 }
 0x15d   :  { %1412 = vmatpush1.bf16.msra.mxu1 %v3350_v14  ;;  %v3392_v14 = vld [vmem:[#allocation6 + $0x420] ss:$8 sps:$4 sm:$0xff]  }
 0x15e   :  { %1413 = vmatprep.subr.bf16.mxu1 %v3358_v17 }
 0x15f   :  { %1217 = vmatpush1.bf16.msra.mxu0 %v3353_v16  ;;  %v3397_v16 = vld [vmem:[#allocation6 + $0x434] ss:$8 sps:$4 sm:$0xff]  }
 0x160   :  { %1218 = vmatprep.subr.bf16.mxu0 %v3361_v20  ;;  %v3395_v20 = vld [vmem:[#allocation6 + $0x430] ss:$8 sps:$4 sm:$0xff]  }
 0x161   :  { %1414 = vmatpush1.bf16.msra.mxu1 %v3356_v18 }
 0x162   :  { %1415 = vmatprep.subr.bf16.mxu1 %v3364_v22 }
 0x163   :  { %1219 = vmatpush1.bf16.msra.mxu0 %v3359_v19 }
 0x164   :  { %1220 = vmatprep.subr.bf16.mxu0 %v3367_v23 }
 0x165   :  { %1416 = vmatpush1.bf16.msra.mxu1 %v3362_v21  ;;  %v3400_v21 = vld [vmem:[#allocation6 + $0x444] ss:$8 sps:$4 sm:$0xff]  }
 0x166   :  { %1417 = vmatprep.subr.bf16.mxu1 %v3370_v24  ;;  %v3398_v24 = vld [vmem:[#allocation6 + $0x440] ss:$8 sps:$4 sm:$0xff]  }
 0x167   :  { %1221 = vmatpush1.bf16.msra.mxu0 %v3365_v25  ;;  %v3403_v25 = vld [vmem:[#allocation6 + $0x454] ss:$8 sps:$4 sm:$0xff]  }
 0x168   :  { %1222 = vmatprep.subr.bf16.mxu0 %v3373_v26  ;;  %v3401_v26 = vld [vmem:[#allocation6 + $0x450] ss:$8 sps:$4 sm:$0xff]  }
 0x169   :  { %1418 = vmatpush1.bf16.msra.mxu1 %v3368_v27  ;;  %v3404_v27 = vld [vmem:[#allocation6 + $0x460] ss:$8 sps:$4 sm:$0xff]  }
 0x16a   :  { %1419 = vmatprep.subr.bf16.mxu1 %v3376_v28  ;;  %v3406_v28 = vld [vmem:[#allocation6 + $0x464] ss:$8 sps:$4 sm:$0xff]  }
 0x16b   :  { %1223 = vmatpush1.bf16.msra.mxu0 %v3371_v29  ;;  %v3409_v29 = vld [vmem:[#allocation6 + $0x474] ss:$8 sps:$4 sm:$0xff]  }
 0x16c   :  { %1668 = vmatprep.subr.bf16.mxu0 %v3388_v38  ;;  %v3421_v38 = vld [vmem:[#allocation6 + $0x4b4] ss:$8 sps:$4 sm:$0xff]  }
 0x16d   :  { %1420 = vmatpush1.bf16.msra.mxu1 %v3374_v30  ;;  %v3407_v30 = vld [vmem:[#allocation6 + $0x470] ss:$8 sps:$4 sm:$0xff]  }
 0x16e   :  { %1421 = vmatprep.subr.bf16.mxu1 %v3379_v33  ;;  %v3410_v33 = vld [vmem:[#allocation6 + $0x480] ss:$8 sps:$4 sm:$0xff]  }
 0x171   :  { %1422 = vmatpush1.bf16.msra.mxu1 %v3377_v32  ;;  %v3412_v32 = vld [vmem:[#allocation6 + $0x484] ss:$8 sps:$4 sm:$0xff]  }
 0x172   :  { %1423 = vmatprep.subr.bf16.mxu1 %v3382_v34  ;;  %v3415_v34 = vld [vmem:[#allocation6 + $0x494] ss:$8 sps:$4 sm:$0xff]  }
 0x175   :  { %1424 = vmatpush1.bf16.msra.mxu1 %v3380_v35  ;;  %v3413_v35 = vld [vmem:[#allocation6 + $0x490] ss:$8 sps:$4 sm:$0xff]  }
 0x176   :  { %1425 = vmatprep.subr.bf16.mxu1 %v3385_v36  ;;  %v3416_v36 = vld [vmem:[#allocation6 + $0x4a0] ss:$8 sps:$4 sm:$0xff]  }
 0x179   :  { %1426 = vmatpush1.bf16.msra.mxu1 %v3383_v37  ;;  %v3418_v37 = vld [vmem:[#allocation6 + $0x4a4] ss:$8 sps:$4 sm:$0xff]  }
 0x201   :  { %v715_v39 = vpop.f32.mrb[4].mxu0 }
 0x202   :  { %v717_v40 = vpop.f32.mrb[5].mxu0  ;;  %v716_v47 = vadd.f32 %v715_v39, %v514_v44  ;;  %v3419_v39 = vld [vmem:[#allocation6 + $0x4b0] ss:$8 sps:$4 sm:$0xff]   ;;  %v3430_v44 = vld [vmem:[#allocation6 + $0x4e4] ss:$8 sps:$4 sm:$0xff]  }
 0x203   :  { %v719_v41 = vpop.f32.mrb[6].mxu0  ;;  %v718_v50 = vadd.f32 %v717_v40, %v518_v45  ;;  %v3424_v40 = vld [vmem:[#allocation6 + $0x4c4] ss:$8 sps:$4 sm:$0xff]   ;;  %v3428_v45 = vld [vmem:[#allocation6 + $0x4e0] ss:$8 sps:$4 sm:$0xff]  }
 0x204   :  { %v720_v42 = vpop.f32.mrb[7].mxu0  ;;  %v3422_v41 = vld [vmem:[#allocation6 + $0x4c0] ss:$8 sps:$4 sm:$0xff]  }
 0x205   :  { %v3427_v42 = vld [vmem:[#allocation6 + $0x4d4] ss:$8 sps:$4 sm:$0xff]  }
 0x20f   :  { %v918_v46 = vpop.f32.mrb[4].mxu1 }
 0x210   :  { %v928_v48 = vrot.slane %v918_v46, %v3719_v59  ;;  %v920_v49 = vpop.f32.mrb[5].mxu1  ;;  %v3433_v46 = vld [vmem:[#allocation6 + $0x4f4] ss:$8 sps:$4 sm:$0xff]  }
 0x211   :  { %v932_v51 = vrot.slane %v920_v49, %v3719_v59  ;;  %v922_v52 = vpop.f32.mrb[6].mxu1  ;;  %v3435_v49 = vld [vmem:[%s3910_s3] sm:$0xff]  }
 0x212   :  { %v933_v53 = vsub.f32 %v716_v47, %v928_v48  ;;  %v923_v54 = vpop.f32.mrb[7].mxu1  ;;  %v3431_v47 = vld [vmem:[#allocation6 + $0x4f0] ss:$8 sps:$4 sm:$0xff]   ;;  %v3434_v48 = vld [vmem:[%s3910_s3 + $0x40] sm:$0xff]  }
 0x213   :  { %v934_v55 = vsub.f32 %v718_v50, %v932_v51  ;;  %v3436_v50 = vld [vmem:[%s3910_s3 + $0x48] sm:$0xff]   ;;  %3069 = vmatprep.subr.bf16.mxu1 %v3434_v48  ;;  %v3438_v52 = vld [vmem:[%s3910_s3 + $0x50] sm:$0xff]   ;;  %v3440_v54 = vld [vmem:[%s3910_s3 + $0x58] sm:$0xff]  }
 0x214   :  { %3454 = vtanh.f32 %v933_v53  ;;  %v3437_v51 = vld [vmem:[%s3910_s3 + $0x8] sm:$0xff]   ;;  %v3439_v53 = vld [vmem:[%s3910_s3 + $0x10] sm:$0xff]  }
 0x215   :  { %3456 = vtanh.f32 %v934_v55  ;;  %v3441_v55 = vld [vmem:[%s3910_s3 + $0x18] sm:$0xff]  }
 0x21e   :  { %v3455_v56 = vpop.eup %3454 }
 0x21f   :  { %v3457_v60 = vpop.eup %3456  ;;  %v1005_v61 = vrot.slane %v3455_v56, 4  ;;  %v1019_v2 = vpack.c.bf16 %v3455_v56, %v3455_v56 }
 0x220   :  { %v1020_v63 = vpack.c.bf16 %v3457_v60, %v3457_v60  ;;  %v1011_v0 = vrot.slane %v3457_v60, 4 }
 0x221   :  { %v1006_v3 = vadd.f32 %v3455_v56, %v1005_v61 }
 0x222   :  { %1224 = vmatprep.mubr.bf16.mxu0 %v1020_v63  ;;  %v1012_v5 = vadd.f32 %v3457_v60, %v1011_v0  ;;  %v2946_v0 = vld [vmem:[%s3911_s4 + $0x2] ss:$8 sm:$0x3] }
 0x223   :  { %1225 = vmatmul.mubr.bf16.vlgmr.msra.gmra.mrb[8].mxu0 %v1019_v2  ;;  %v1007_v6 = vrot.slane %v1006_v3, 2  ;;  %v1029_v2 = vrot.slane %v2946_v0, %v3725_v62 }
 0x224   :  { %v1013_v7 = vrot.slane %v1012_v5, 2  ;;  %1669 = vmatpush1.bf16.msra.mxu0 %v3386_v1  ;;  %v1025_v1 = vrot.slane %v2946_v0, %v3719_v59 }
 0x225   :  { %v1008_v9 = vadd.f32 %v1007_v6, %v1006_v3  ;;  %1670 = vmatprep.subr.bf16.mxu0 %v3391_v4 }
 0x226   :  { %v1014_v11 = vadd.f32 %v1013_v7, %v1012_v5 }
 0x227   :  { %v1009_v12 = vrot.slane %v1008_v9, 1 }
 0x228   :  { %v1015_v13 = vrot.slane %v1014_v11, 1  ;;  %1671 = vmatpush1.bf16.msra.mxu0 %v3389_v8 }
 0x229   :  { %v1010_v15 = vadd.f32 %v1009_v12, %v1008_v9  ;;  %1672 = vmatprep.subr.bf16.mxu0 %v3394_v10 }
 0x22a   :  { %v1016_v17 = vadd.f32 %v1015_v13, %v1014_v11 }
 0x22b   :  { %v1017_v18 = vmul.f32 0.125, %v1010_v15 }
 0x22c   :  { %v1018_v19 = vmul.f32 0.125, %v1016_v17  ;;  %1673 = vmatpush1.bf16.msra.mxu0 %v3392_v14 }
 0x22d   :  { %1674 = vmatprep.subr.bf16.mxu0 %v3397_v16  ;;  %v1233_v23 = vpack.c.bf16 %v1017_v18, %v1017_v18 }
 0x22e   :  { %v1234_v22 = vpack.c.bf16 %v1018_v19, %v1018_v19 }
 0x230   :  { %1427 = vmatprep.mubr.bf16.mxu1 %v1234_v22  ;;  %1675 = vmatpush1.bf16.msra.mxu0 %v3395_v20 }
 0x231   :  { %1428 = vmatmul.mubr.bf16.vlgmr.msra.gmra.mrb[8].mxu1 %v1233_v23  ;;  %1676 = vmatprep.subr.bf16.mxu0 %v3400_v21 }
 0x232   :  { %3070 = vmatpush3.bf16.msra.mxu1 %v3435_v49 }
 0x233   :  { %3071 = vmatprep.subr.bf16.mxu1 %v3436_v50 }
 0x234   :  { %1677 = vmatpush1.bf16.msra.mxu0 %v3398_v24 }
 0x235   :  { %1678 = vmatprep.subr.bf16.mxu0 %v3403_v25 }
 0x236   :  { %3072 = vmatpush3.bf16.msra.mxu1 %v3437_v51 }
 0x237   :  { %3073 = vmatprep.subr.bf16.mxu1 %v3438_v52 }
 0x238   :  { %1679 = vmatpush1.bf16.msra.mxu0 %v3401_v26 }
 0x239   :  { %1680 = vmatprep.subr.bf16.mxu0 %v3406_v28 }
 0x23a   :  { %3074 = vmatpush3.bf16.msra.mxu1 %v3439_v53 }
 0x23b   :  { %3075 = vmatprep.subr.bf16.mxu1 %v3440_v54 }
 0x23c   :  { %1681 = vmatpush1.bf16.msra.mxu0 %v3404_v27 }
 0x23d   :  { %1682 = vmatprep.subr.bf16.mxu0 %v3409_v29  ;;  %v3442_v29 = vld [vmem:[%s3910_s3 + $0x60] sm:$0xff]  }
 0x23e   :  { %3076 = vmatpush3.bf16.msra.mxu1 %v3441_v55 }
 0x23f   :  { %3077 = vmatprep.subr.bf16.mxu1 %v3442_v29 }
 0x240   :  { %1683 = vmatpush1.bf16.msra.mxu0 %v3407_v30  ;;  %v3443_v30 = vld [vmem:[%s3910_s3 + $0x20] sm:$0xff]  }
 0x241   :  { %1684 = vmatprep.subr.bf16.mxu0 %v3412_v32  ;;  %v3444_v32 = vld [vmem:[%s3910_s3 + $0x68] sm:$0xff]  }
 0x242   :  { %3078 = vmatpush3.bf16.msra.mxu1 %v3443_v30 }
 0x243   :  { %3079 = vmatprep.subr.bf16.mxu1 %v3444_v32 }
 0x244   :  { %1685 = vmatpush1.bf16.msra.mxu0 %v3410_v33  ;;  %v3445_v33 = vld [vmem:[%s3910_s3 + $0x28] sm:$0xff]  }
 0x245   :  { %1686 = vmatprep.subr.bf16.mxu0 %v3415_v34  ;;  %v3446_v34 = vld [vmem:[%s3910_s3 + $0x70] sm:$0xff]  }
 0x246   :  { %3080 = vmatpush3.bf16.msra.mxu1 %v3445_v33 }
 0x247   :  { %3081 = vmatprep.subr.bf16.mxu1 %v3446_v34 }
 0x248   :  { %1687 = vmatpush1.bf16.msra.mxu0 %v3413_v35  ;;  %v3447_v35 = vld [vmem:[%s3910_s3 + $0x30] sm:$0xff]  }
 0x249   :  { %1688 = vmatprep.subr.bf16.mxu0 %v3418_v37  ;;  %v3449_v37 = vld [vmem:[%s3910_s3 + $0x38] sm:$0xff]  }
 0x24a   :  { %3082 = vmatpush3.bf16.msra.mxu1 %v3447_v35 }
 0x24c   :  { %1689 = vmatpush1.bf16.msra.mxu0 %v3416_v36  ;;  %v3448_v36 = vld [vmem:[%s3910_s3 + $0x78] sm:$0xff]   ;;  %s3538_s3 = smov [#allocation4]  }
 0x24d   :  { %1690 = vmatprep.subr.bf16.mxu0 %v3421_v38  ;;  %3083 = vmatprep.subr.bf16.mxu1 %v3448_v36  ;;  %v3011_v38 = vld [vmem:[%s3911_s4 + $0x3] ss:$8 sm:$0x3]  ;;  %s261_s30 = sshll.u32 %s3538_s3, 4  ;;  %s262_s30 = int_to_ptr.vmem [resolvable:$true] %s261_s30 }
 0x24e   :  { %3084 = vmatpush3.bf16.msra.mxu1 %v3449_v37 }
 0x250   :  { %1691 = vmatpush1.bf16.msra.mxu0 %v3419_v39  ;;  %v1661_v39 = vrot.slane %v3011_v38, %v3719_v59 }
 0x251   :  { %1692 = vmatprep.subr.bf16.mxu0 %v3424_v40  ;;  %v1665_v40 = vrot.slane %v3011_v38, %v3725_v62 }
 0x254   :  { %1693 = vmatpush1.bf16.msra.mxu0 %v3422_v41 }
 0x255   :  { %1694 = vmatprep.subr.bf16.mxu0 %v3427_v42 }
 0x258   :  { %1695 = vmatpush1.bf16.msra.mxu0 %v3425_v43 }
 0x259   :  { %1696 = vmatprep.subr.bf16.mxu0 %v3430_v44 }
 0x25c   :  { %1697 = vmatpush1.bf16.msra.mxu0 %v3428_v45 }
 0x25d   :  { %1698 = vmatprep.subr.bf16.mxu0 %v3433_v46 }
 0x260   :  { %1699 = vmatpush1.bf16.msra.mxu0 %v3431_v47 }
 0x2f6   :  { %v1226_v56 = vpop.f32.mrb[8].mxu0 }
 0x2f7   :  { %v1228_v60 = vpop.f32.mrb[9].mxu0  ;;  %v1227_v4 = vadd.f32 %v1226_v56, %v1025_v1 }
 0x2f8   :  { %v1230_v61 = vpop.f32.mrb[10].mxu0  ;;  %v1229_v7 = vadd.f32 %v1228_v60, %v1029_v2 }
 0x2f9   :  { %v1231_v63 = vpop.f32.mrb[11].mxu0 }
 0x304   :  { %v1429_v3 = vpop.f32.mrb[8].mxu1 }
 0x305   :  { %v1439_v5 = vrot.slane %v1429_v3, %v3719_v59  ;;  %v1431_v6 = vpop.f32.mrb[9].mxu1 }
 0x306   :  { %v1443_v8 = vrot.slane %v1431_v6, %v3719_v59  ;;  %v1433_v9 = vpop.f32.mrb[10].mxu1 }
 0x307   :  { %v1444_v10 = vsub.f32 %v1227_v4, %v1439_v5  ;;  %v1434_v11 = vpop.f32.mrb[11].mxu1 }
 0x308   :  { %v1445_v12 = vsub.f32 %v1229_v7, %v1443_v8 }
 0x309   :  { %3458 = vtanh.f32 %v1444_v10 }
 0x30a   :  { %3460 = vtanh.f32 %v1445_v12 }
 0x313   :  { %v3459_v13 = vpop.eup %3458 }
 0x314   :  { %v3461_v14 = vpop.eup %3460  ;;  %v1448_v15 = vrot.slane %v3459_v13, 4 }
 0x315   :  { %v1454_v16 = vrot.slane %v3461_v14, 4 }
 0x316   :  { %v1449_v17 = vmax.f32 %v3459_v13, %v1448_v15 }
 0x317   :  { %v1455_v18 = vmax.f32 %v3461_v14, %v1454_v16 }
 0x318   :  { %v1450_v19 = vrot.slane %v1449_v17, 2 }
 0x319   :  { %v1456_v20 = vrot.slane %v1455_v18, 2 }
 0x31a   :  { %v1451_v21 = vmax.f32 %v1449_v17, %v1450_v19 }
 0x31b   :  { %v1457_v22 = vmax.f32 %v1455_v18, %v1456_v20 }
 0x31c   :  { %v1452_v23 = vrot.slane %v1451_v21, 1 }
 0x31d   :  { %v1458_v24 = vrot.slane %v1457_v22, 1 }
 0x31e   :  { %v1453_v25 = vmax.f32 %v1451_v21, %v1452_v23 }
 0x31f   :  { %v1459_v26 = vmax.f32 %v1457_v22, %v1458_v24 }
 0x320   :  { %v1493_v28 = vpack.c.bf16 %v1453_v25, %v1453_v25 }
 0x321   :  { %v1494_v27 = vpack.c.bf16 %v1459_v26, %v1459_v26 }
 0x323   :  { %1700 = vmatprep.mubr.bf16.mxu0 %v1494_v27 }
 0x324   :  { %1701 = vmatmul.mubr.bf16.vlgmr.msra.gmra.mrb[12].mxu0 %v1493_v28 }
 0x3f7   :  { %v1702_v41 = vpop.f32.mrb[12].mxu0 }
 0x3f8   :  { %v1703_v42 = vadd.f32 %v1702_v41, %v1661_v39  ;;  %v1704_v43 = vpop.f32.mrb[13].mxu0 }
 0x3f9   :  { %v1705_v44 = vadd.f32 %v1704_v43, %v1665_v40  ;;  %v1706_v45 = vpop.f32.mrb[14].mxu0 }
 0x3fa   :  { %3462 = vtanh.f32 %v1703_v42  ;;  %v1707_v46 = vpop.f32.mrb[15].mxu0 }
 0x3fb   :  { %3464 = vtanh.f32 %v1705_v44 }
 0x404   :  { %v3463_v47 = vpop.eup %3462 }
 0x405   :  { %v3465_v48 = vpop.eup %3464  ;;  %v1743_v50 = vpack.c.bf16 %v3463_v47, %v3463_v47 }
 0x406   :  { %v1744_v49 = vpack.c.bf16 %v3465_v48, %v3465_v48 }
 0x408   :  { %1874 = vmatprep.mubr.bf16.mxu1 %v1744_v49 }
 0x409   :  { %1875 = vmatmul.mubr.bf16.vlgmr.msra.gmra.mrb[12].mxu1 %v1743_v50 }
 0x40a   :  { %3503 = shalt.err (!%p3500_p10)  }
 0x40b   :  { %s3504_s15 = scalar_lea.vmem %s262_s30, 8192  ;;  %p3509_p12 = scmp.lt.s32.totalorder %s262_s30, %s262_s30 }
 0x40c   :  { %p3505_p11 = scmp.ne.s32.totalorder %s262_s30, %s3504_s15  ;;  %p3510_p13 = scmp.lt.s32.totalorder %s3504_s15, %s3504_s15 }
 0x40e   :  { %p3511_p0 = por %p3510_p13, %p3509_p12 }
 0x410   :  { %p3512_p1 = pnand %p3511_p0, %p3505_p11 }
 0x412   :  { %3515 = shalt.err (!%p3512_p1)  }
 0x413   :  { %264 = dma.hbm_to_vmem [thread:$0]  %s3914_s7, 8192, %s262_s30, [#allocation5 + $0x2]  ;;  %v1745_v52 = vld [vmem:[%s3911_s4 + $0x4] ss:$0 sm:$0xff] }
 0x4dc   :  { %v3085_v51 = vpop.f32.mrb[12].mxu1 }
 0x4dd   :  { %v3086_v53 = vpop.f32.mrb[13].mxu1 }
 0x4de   :  { %v3087_v54 = vadd.f32 %v3086_v53, %v3085_v51  ;;  %v3088_v55 = vpop.f32.mrb[14].mxu1 }
 0x4df   :  { %v3089_v56 = vpop.f32.mrb[15].mxu1 }
 0x4e0   :  { %v1877_v60 = vadd.f32 %v3087_v54, %v1745_v52 }
 0x4e1   :  { %3518 = dma.done.wait [#allocation5], 2048 }
 0x4e2   :  { %3519 = vsyncadd [#allocation5], 4294965248 }
 0x4e3   :  { %3520 = dma.done.wait [#allocation5 + $0x1], 20480 }
 0x4e4   :  { %3521 = vsyncadd [#allocation5 + $0x1], 4294946816 }
 0x4e5   :  { %3522 = dma.done.wait [#allocation5 + $0x2], 8192 }
 0x4e6   :  { %3523 = vsyncadd [#allocation5 + $0x2], 4294959104  ;;  %1994 = vmatprep.mubr.bf16.mxu1 %v3529_v31  ;;  %v1901_v61 = vld [vmem:[#allocation2 + $0x8] sm:$0xff]  ;;  %v1900_v63 = vld [vmem:[#allocation2] sm:$0xff]  ;;  %v3814_v6 = vpack.c.bf16 %v1877_v60, %v1877_v60  ;;  %vm1958_vm3 = vcmask 261120  }
 0x4e7   :  { %v1909_v0 = vld [vmem:[#allocation2 + $0x48] sm:$0xff]  ;;  %1962 = vmatprep.subr.bf16.mxu1 %v1901_v61  ;;  %v1908_v1 = vld [vmem:[#allocation2 + $0x40] sm:$0xff]  ;;  %v1903_v2 = vld [vmem:[#allocation2 + $0x18] sm:$0xff] }
 0x4e8   :  { %1963 = vmatpush1.bf16.msra.mxu1 %v1900_v63  ;;  %v2135_v3 = vld [vmem:[#allocation3 + $0x8] sm:$0xff]  ;;  %v2134_v4 = vld [vmem:[#allocation3] sm:$0xff]  ;;  %v2137_v5 = vld [vmem:[#allocation3 + $0x58] sm:$0xff] }
 0x4e9   :  { %1964 = vmatprep.subr.bf16.mxu1 %v1909_v0  ;;  %2179 = vmatprep.subr.bf16.mxu0 %v2135_v3  ;;  %v1902_v7 = vld [vmem:[#allocation2 + $0x10] sm:$0xff]  ;;  %v1911_v8 = vld [vmem:[#allocation2 + $0x58] sm:$0xff]  ;;  %v2139_v10 = vld [vmem:[#allocation3 + $0xa8] sm:$0xff] }
 0x4ea   :  { %2180 = vmatpush1.bf16.msra.mxu0 %v2134_v4  ;;  %v2136_v9 = vld [vmem:[#allocation3 + $0x50] sm:$0xff]  ;;  %v1905_v12 = vld [vmem:[#allocation2 + $0x28] sm:$0xff]  ;;  %v2138_v13 = vld [vmem:[#allocation3 + $0xa0] sm:$0xff] }
 0x4eb   :  { %2181 = vmatprep.subr.bf16.mxu0 %v2137_v5  ;;  %v1910_v11 = vld [vmem:[#allocation2 + $0x50] sm:$0xff]  ;;  %v2141_v14 = vld [vmem:[#allocation3 + $0xf8] sm:$0xff]  ;;  %v1904_v15 = vld [vmem:[#allocation2 + $0x20] sm:$0xff] }
 0x4ec   :  { %1965 = vmatpush1.bf16.msra.mxu1 %v1908_v1  ;;  %v1913_v16 = vld [vmem:[#allocation2 + $0x68] sm:$0xff]  ;;  %v2140_v17 = vld [vmem:[#allocation3 + $0xf0] sm:$0xff]  ;;  %v1912_v19 = vld [vmem:[#allocation2 + $0x60] sm:$0xff] }
 0x4ed   :  { %2003 = vmatprep.subr.bf16.mxu1 %v1903_v2  ;;  %v2143_v18 = vld [vmem:[#allocation3 + $0x148] sm:$0xff]  ;;  %v2142_v20 = vld [vmem:[#allocation3 + $0x140] sm:$0xff]  ;;  %v2145_v21 = vld [vmem:[#allocation3 + $0x198] sm:$0xff] }
 0x4ee   :  { %2182 = vmatpush1.bf16.msra.mxu0 %v2136_v9  ;;  %v2144_v22 = vld [vmem:[#allocation3 + $0x190] sm:$0xff]  ;;  %v2147_v23 = vld [vmem:[#allocation3 + $0x1e8] sm:$0xff]  ;;  %v2146_v24 = vld [vmem:[#allocation3 + $0x1e0] sm:$0xff] }
 0x4ef   :  { %3062 = vmatmul.mubr.msk.bf16.vlgmr.msra.gmra.mrb[16].mxu1 %vm1958_vm3, %v3814_v6  ;;  %2183 = vmatprep.subr.bf16.mxu0 %v2139_v10  ;;  %v2149_v25 = vld [vmem:[#allocation3 + $0x238] sm:$0xff]  ;;  %v2148_v26 = vld [vmem:[#allocation3 + $0x230] sm:$0xff]  ;;  %v2151_v27 = vld [vmem:[#allocation3 + $0x288] sm:$0xff] }
 0x4f0   :  { %2004 = vmatpush1.bf16.msra.mxu1 %v1902_v7  ;;  %2035 = vmatprep.mubr.bf16.mxu1 %v3529_v31  ;;  %v2150_v28 = vld [vmem:[#allocation3 + $0x280] sm:$0xff]  ;;  %v2153_v29 = vld [vmem:[#allocation3 + $0x2d8] sm:$0xff]  ;;  %v2152_v30 = vld [vmem:[#allocation3 + $0x2d0] sm:$0xff] }
 0x4f1   :  { %2005 = vmatprep.subr.bf16.mxu1 %v1911_v8  ;;  %v2155_v32 = vld [vmem:[#allocation3 + $0x328] sm:$0xff]  ;;  %v2154_v33 = vld [vmem:[#allocation3 + $0x320] sm:$0xff]  ;;  %v2156_v34 = vld [vmem:[#allocation3 + $0x370] sm:$0xff] }
 0x4f2   :  { %2184 = vmatpush1.bf16.msra.mxu0 %v2138_v13  ;;  %v2159_v35 = vld [vmem:[#allocation3 + $0x3c8] sm:$0xff]  ;;  %v2158_v36 = vld [vmem:[#allocation3 + $0x3c0] sm:$0xff]  ;;  %v2161_v37 = vld [vmem:[#allocation3 + $0x418] sm:$0xff] }
 0x4f3   :  { %2185 = vmatprep.subr.bf16.mxu0 %v2141_v14  ;;  %v2160_v38 = vld [vmem:[#allocation3 + $0x410] sm:$0xff]  ;;  %v2163_v39 = vld [vmem:[#allocation3 + $0x468] sm:$0xff]  ;;  %v2162_v40 = vld [vmem:[#allocation3 + $0x460] sm:$0xff] }
 0x4f4   :  { %2006 = vmatpush1.bf16.msra.mxu1 %v1910_v11  ;;  %v2165_v41 = vld [vmem:[#allocation3 + $0x4b8] sm:$0xff]  ;;  %v2164_v42 = vld [vmem:[#allocation3 + $0x4b0] sm:$0xff]  ;;  %v2310_v47 = vld [vmem:[#allocation3 + $0x28] sm:$0xff] }
 0x4f5   :  { %2044 = vmatprep.subr.bf16.mxu1 %v1905_v12  ;;  %v1907_v43 = vld [vmem:[#allocation2 + $0x38] sm:$0xff]  ;;  %v1906_v44 = vld [vmem:[#allocation2 + $0x30] sm:$0xff]  ;;  %v2225_v50 = vld [vmem:[#allocation3 + $0x68] sm:$0xff] }
 0x4f6   :  { %2186 = vmatpush1.bf16.msra.mxu0 %v2140_v17  ;;  %v1915_v45 = vld [vmem:[#allocation2 + $0x78] sm:$0xff]  ;;  %v1914_v46 = vld [vmem:[#allocation2 + $0x70] sm:$0xff]  ;;  %v2224_v51 = vld [vmem:[#allocation3 + $0x60] sm:$0xff] }
 0x4f7   :  { %3063 = vmatmul.mubr.msk.bf16.vlgmr.msra.gmra.mrb[20].mxu1 %vm1958_vm3, %v3814_v6  ;;  %2187 = vmatprep.subr.bf16.mxu0 %v2143_v18  ;;  %v2223_v48 = vld [vmem:[#allocation3 + $0x18] sm:$0xff]  ;;  %v2222_v49 = vld [vmem:[#allocation3 + $0x10] sm:$0xff]  ;;  %v2229_v54 = vld [vmem:[#allocation3 + $0x108] sm:$0xff] }
 0x4f8   :  { %2045 = vmatpush1.bf16.msra.mxu1 %v1904_v15  ;;  %2076 = vmatprep.mubr.bf16.mxu1 %v3529_v31  ;;  %v2227_v52 = vld [vmem:[#allocation3 + $0xb8] sm:$0xff]  ;;  %v2226_v53 = vld [vmem:[#allocation3 + $0xb0] sm:$0xff]  ;;  %v2228_v55 = vld [vmem:[#allocation3 + $0x100] sm:$0xff] }
 0x4f9   :  { %2046 = vmatprep.subr.bf16.mxu1 %v1913_v16  ;;  %v2231_v56 = vld [vmem:[#allocation3 + $0x158] sm:$0xff]  ;;  %v2230_v60 = vld [vmem:[#allocation3 + $0x150] sm:$0xff]  ;;  %v2233_v61 = vld [vmem:[#allocation3 + $0x1a8] sm:$0xff] }
 0x4fa   :  { %2188 = vmatpush1.bf16.msra.mxu0 %v2142_v20  ;;  %v2232_v63 = vld [vmem:[#allocation3 + $0x1a0] sm:$0xff]  ;;  %v2235_v0 = vld [vmem:[#allocation3 + $0x1f8] sm:$0xff]  ;;  %v2234_v1 = vld [vmem:[#allocation3 + $0x1f0] sm:$0xff] }
 0x4fb   :  { %2189 = vmatprep.subr.bf16.mxu0 %v2145_v21  ;;  %v2237_v2 = vld [vmem:[#allocation3 + $0x248] sm:$0xff]  ;;  %v2236_v3 = vld [vmem:[#allocation3 + $0x240] sm:$0xff]  ;;  %v2239_v4 = vld [vmem:[#allocation3 + $0x298] sm:$0xff] }
 0x4fc   :  { %2047 = vmatpush1.bf16.msra.mxu1 %v1912_v19  ;;  %v2238_v5 = vld [vmem:[#allocation3 + $0x290] sm:$0xff]  ;;  %v2240_v7 = vld [vmem:[#allocation3 + $0x2e0] sm:$0xff]  ;;  %v2243_v8 = vld [vmem:[#allocation3 + $0x338] sm:$0xff] }
 0x4fd   :  { %2085 = vmatprep.subr.bf16.mxu1 %v1907_v43  ;;  %v2242_v9 = vld [vmem:[#allocation3 + $0x330] sm:$0xff]  ;;  %v2245_v10 = vld [vmem:[#allocation3 + $0x388] sm:$0xff]  ;;  %v2244_v11 = vld [vmem:[#allocation3 + $0x380] sm:$0xff] }
 0x4fe   :  { %2190 = vmatpush1.bf16.msra.mxu0 %v2144_v22  ;;  %v2247_v12 = vld [vmem:[#allocation3 + $0x3d8] sm:$0xff]  ;;  %v2246_v13 = vld [vmem:[#allocation3 + $0x3d0] sm:$0xff]  ;;  %v2249_v14 = vld [vmem:[#allocation3 + $0x428] sm:$0xff] }
 0x4ff   :  { %3064 = vmatmul.mubr.msk.bf16.vlgmr.msra.gmra.mrb[24].mxu1 %vm1958_vm3, %v3814_v6  ;;  %2191 = vmatprep.subr.bf16.mxu0 %v2147_v23  ;;  %v2248_v15 = vld [vmem:[#allocation3 + $0x420] sm:$0xff]  ;;  %v2251_v16 = vld [vmem:[#allocation3 + $0x478] sm:$0xff]  ;;  %v2250_v17 = vld [vmem:[#allocation3 + $0x470] sm:$0xff] }
 0x500   :  { %2117 = vmatprep.mubr.bf16.mxu1 %v3529_v31  ;;  %v2157_v31 = vld [vmem:[#allocation3 + $0x378] sm:$0xff]  ;;  %2086 = vmatpush1.bf16.msra.mxu1 %v1906_v44  ;;  %v2253_v18 = vld [vmem:[#allocation3 + $0x4c8] sm:$0xff]  ;;  %v2252_v19 = vld [vmem:[#allocation3 + $0x4c0] sm:$0xff] }
 0x501   :  { %2087 = vmatprep.subr.bf16.mxu1 %v1915_v45  ;;  %v2397_v20 = vld [vmem:[#allocation3 + $0x38] sm:$0xff]  ;;  %v1940_v45 = vsub.s32 5, %v3716_v58 }
 0x502   :  { %2192 = vmatpush1.bf16.msra.mxu0 %v2146_v24  ;;  %v3830_v21 = vld [vmem:[%s3915_s8] ss:$4 sm:$0xff] }
 0x503   :  { %2193 = vmatprep.subr.bf16.mxu0 %v2149_v25  ;;  %v1921_v22 = vrot.slane %v3830_v21, %v3719_v59  ;;  %v1925_v23 = vrot.slane %v3830_v21, %v3725_v62 }
 0x504   :  { %2088 = vmatpush1.bf16.msra.mxu1 %v1914_v46  ;;  %v2311_v46 = vld [vmem:[#allocation3 + $0x70] sm:$0xff] }
 0x505   :  { %2266 = vmatprep.subr.bf16.mxu1 %v2223_v48 }
 0x506   :  { %2194 = vmatpush1.bf16.msra.mxu0 %v2148_v26 }
 0x507   :  { %2195 = vmatprep.subr.bf16.mxu0 %v2151_v27  ;;  %3065 = vmatmul.mubr.msk.bf16.vlgmr.msra.gmra.mrb[28].mxu1 %vm1958_vm3, %v3814_v6  ;;  %v2241_v6 = vld [vmem:[#allocation3 + $0x2e8] sm:$0xff]  ;;  %v1928_v27 = vsub.s32 2, %v3716_v58 }
 0x508   :  { %2267 = vmatpush1.bf16.msra.mxu1 %v2222_v49  ;;  %v2314_v49 = vld [vmem:[#allocation3 + $0xc8] sm:$0xff] }
 0x509   :  { %2268 = vmatprep.subr.bf16.mxu1 %v2225_v50 }
 0x50a   :  { %2196 = vmatpush1.bf16.msra.mxu0 %v2150_v28 }
 0x50b   :  { %2197 = vmatprep.subr.bf16.mxu0 %v2153_v29 }
 0x50c   :  { %2269 = vmatpush1.bf16.msra.mxu1 %v2224_v51 }
 0x50d   :  { %2270 = vmatprep.subr.bf16.mxu1 %v2227_v52 }
 0x50e   :  { %2198 = vmatpush1.bf16.msra.mxu0 %v2152_v30  ;;  %v1932_v30 = vsub.s32 3, %v3716_v58 }
 0x50f   :  { %2199 = vmatprep.subr.bf16.mxu0 %v2155_v32 }
 0x510   :  { %2271 = vmatpush1.bf16.msra.mxu1 %v2226_v53  ;;  %v1941_v53 = vrot.slane %v3830_v21, %v1940_v45 }
 0x511   :  { %2272 = vmatprep.subr.bf16.mxu1 %v2229_v54  ;;  %v2313_v54 = vld [vmem:[#allocation3 + $0xc0] sm:$0xff] }
 0x512   :  { %2200 = vmatpush1.bf16.msra.mxu0 %v2154_v33 }
 0x513   :  { %2201 = vmatprep.subr.bf16.mxu0 %v2157_v31 }
 0x514   :  { %2273 = vmatpush1.bf16.msra.mxu1 %v2228_v55  ;;  %v2396_v55 = vld [vmem:[#allocation3 + $0x30] sm:$0xff] }
 0x515   :  { %2274 = vmatprep.subr.bf16.mxu1 %v2231_v56  ;;  %v2316_v56 = vld [vmem:[#allocation3 + $0x118] sm:$0xff] }
 0x516   :  { %2202 = vmatpush1.bf16.msra.mxu0 %v2156_v34  ;;  %v1929_v34 = vrot.slane %v3830_v21, %v1928_v27 }
 0x517   :  { %2203 = vmatprep.subr.bf16.mxu0 %v2159_v35 }
 0x518   :  { %2275 = vmatpush1.bf16.msra.mxu1 %v2230_v60 }
 0x519   :  { %2276 = vmatprep.subr.bf16.mxu1 %v2233_v61  ;;  %v2399_v61 = vld [vmem:[#allocation3 + $0x88] sm:$0xff] }
 0x51a   :  { %2204 = vmatpush1.bf16.msra.mxu0 %v2158_v36  ;;  %v1933_v36 = vrot.slane %v3830_v21, %v1932_v30 }
 0x51b   :  { %2205 = vmatprep.subr.bf16.mxu0 %v2161_v37 }
 0x51c   :  { %2277 = vmatpush1.bf16.msra.mxu1 %v2232_v63 }
 0x51d   :  { %2278 = vmatprep.subr.bf16.mxu1 %v2235_v0 }
 0x51e   :  { %2206 = vmatpush1.bf16.msra.mxu0 %v2160_v38  ;;  %v2309_v38 = vld [vmem:[#allocation3 + $0x20] sm:$0xff] }
 0x51f   :  { %2207 = vmatprep.subr.bf16.mxu0 %v2163_v39  ;;  %v2312_v39 = vld [vmem:[#allocation3 + $0x78] sm:$0xff] }
 0x520   :  { %2279 = vmatpush1.bf16.msra.mxu1 %v2234_v1 }
 0x521   :  { %2280 = vmatprep.subr.bf16.mxu1 %v2237_v2  ;;  %v2315_v2 = vld [vmem:[#allocation3 + $0x110] sm:$0xff] }
 0x522   :  { %2208 = vmatpush1.bf16.msra.mxu0 %v2162_v40 }
 0x523   :  { %2209 = vmatprep.subr.bf16.mxu0 %v2165_v41 }
 0x524   :  { %2281 = vmatpush1.bf16.msra.mxu1 %v2236_v3 }
 0x525   :  { %2282 = vmatprep.subr.bf16.mxu1 %v2239_v4  ;;  %v2398_v4 = vld [vmem:[#allocation3 + $0x80] sm:$0xff] }
 0x526   :  { %2210 = vmatpush1.bf16.msra.mxu0 %v2164_v42 }
 0x527   :  { %2353 = vmatprep.subr.bf16.mxu0 %v2310_v47 }
 0x528   :  { %2283 = vmatpush1.bf16.msra.mxu1 %v2238_v5  ;;  %v2318_v5 = vld [vmem:[#allocation3 + $0x168] sm:$0xff] }
 0x529   :  { %2284 = vmatprep.subr.bf16.mxu1 %v2241_v6 }
 0x52c   :  { %2285 = vmatpush1.bf16.msra.mxu1 %v2240_v7  ;;  %v2401_v7 = vld [vmem:[#allocation3 + $0xd8] sm:$0xff] }
 0x52d   :  { %2286 = vmatprep.subr.bf16.mxu1 %v2243_v8 }
 0x530   :  { %2287 = vmatpush1.bf16.msra.mxu1 %v2242_v9  ;;  %v2317_v9 = vld [vmem:[#allocation3 + $0x160] sm:$0xff] }
 0x531   :  { %2288 = vmatprep.subr.bf16.mxu1 %v2245_v10  ;;  %v2400_v10 = vld [vmem:[#allocation3 + $0xd0] sm:$0xff] }
 0x534   :  { %2289 = vmatpush1.bf16.msra.mxu1 %v2244_v11  ;;  %v2320_v11 = vld [vmem:[#allocation3 + $0x1b8] sm:$0xff] }
 0x535   :  { %2290 = vmatprep.subr.bf16.mxu1 %v2247_v12  ;;  %v2403_v12 = vld [vmem:[#allocation3 + $0x128] sm:$0xff] }
 0x538   :  { %2291 = vmatpush1.bf16.msra.mxu1 %v2246_v13  ;;  %v2319_v13 = vld [vmem:[#allocation3 + $0x1b0] sm:$0xff] }
 0x539   :  { %2292 = vmatprep.subr.bf16.mxu1 %v2249_v14  ;;  %v2402_v14 = vld [vmem:[#allocation3 + $0x120] sm:$0xff] }
 0x53c   :  { %2293 = vmatpush1.bf16.msra.mxu1 %v2248_v15  ;;  %v2322_v15 = vld [vmem:[#allocation3 + $0x208] sm:$0xff] }
 0x53d   :  { %2294 = vmatprep.subr.bf16.mxu1 %v2251_v16  ;;  %v2405_v16 = vld [vmem:[#allocation3 + $0x178] sm:$0xff] }
 0x540   :  { %2295 = vmatpush1.bf16.msra.mxu1 %v2250_v17  ;;  %v2321_v17 = vld [vmem:[#allocation3 + $0x200] sm:$0xff] }
 0x541   :  { %2296 = vmatprep.subr.bf16.mxu1 %v2253_v18  ;;  %v2404_v18 = vld [vmem:[#allocation3 + $0x170] sm:$0xff] }
 0x544   :  { %2297 = vmatpush1.bf16.msra.mxu1 %v2252_v19  ;;  %v2324_v19 = vld [vmem:[#allocation3 + $0x258] sm:$0xff] }
 0x545   :  { %2440 = vmatprep.subr.bf16.mxu1 %v2397_v20  ;;  %v2407_v20 = vld [vmem:[#allocation3 + $0x1c8] sm:$0xff] }
 0x5c2   :  { %v1996_v24 = vpop.f32.mrb[16].mxu1 }
 0x5c3   :  { %v1997_v25 = vadd.f32 %v1996_v24, %v1921_v22  ;;  %v1998_v26 = vpop.f32.mrb[17].mxu1  ;;  %v2323_v22 = vld [vmem:[#allocation3 + $0x250] sm:$0xff]  ;;  %v2326_v24 = vld [vmem:[#allocation3 + $0x2a8] sm:$0xff] }
 0x5c4   :  { %v1999_v28 = vadd.f32 %v1998_v26, %v1925_v23  ;;  %v2000_v29 = vpop.f32.mrb[18].mxu1  ;;  %v2406_v23 = vld [vmem:[#allocation3 + $0x1c0] sm:$0xff] }
 0x5c5   :  { %v2126_v32 = vmax.f32 %v1997_v25, 0.0  ;;  %v2001_v33 = vpop.f32.mrb[19].mxu1  ;;  %v2409_v25 = vld [vmem:[#allocation3 + $0x218] sm:$0xff]  ;;  %v2325_v26 = vld [vmem:[#allocation3 + $0x2a0] sm:$0xff] }
 0x5c6   :  { %v2127_v31 = vmax.f32 %v1999_v28, 0.0  ;;  %v2408_v28 = vld [vmem:[#allocation3 + $0x210] sm:$0xff]  ;;  %v2328_v29 = vld [vmem:[#allocation3 + $0x2f8] sm:$0xff] }
 0x5c7   :  { %v2166_v37 = vpack.c.bf16 %v2126_v32, %v2126_v32  ;;  %v2411_v32 = vld [vmem:[#allocation3 + $0x268] sm:$0xff]  ;;  %v2327_v33 = vld [vmem:[#allocation3 + $0x2f0] sm:$0xff] }
 0x5c8   :  { %v2167_v35 = vpack.c.bf16 %v2127_v31, %v2127_v31  ;;  %v2330_v31 = vld [vmem:[#allocation3 + $0x348] sm:$0xff] }
 0x5ca   :  { %2211 = vmatprep.mubr.bf16.mxu0 %v2167_v35  ;;  %v2037_v40 = vpop.f32.mrb[20].mxu1  ;;  %v2332_v35 = vld [vmem:[#allocation3 + $0x398] sm:$0xff] }
 0x5cb   :  { %2212 = vmatmul.mubr.bf16.vlgmr.msra.gmra.mrb[16].mxu0 %v2166_v37  ;;  %v2038_v41 = vadd.f32 %v2037_v40, %v1929_v34  ;;  %v2039_v42 = vpop.f32.mrb[21].mxu1  ;;  %v2329_v34 = vld [vmem:[#allocation3 + $0x340] sm:$0xff]  ;;  %v2334_v37 = vld [vmem:[#allocation3 + $0x3e8] sm:$0xff]  ;;  %v2336_v40 = vld [vmem:[#allocation3 + $0x438] sm:$0xff] }
 0x5cc   :  { %2354 = vmatpush1.bf16.msra.mxu0 %v2309_v38  ;;  %v2040_v43 = vadd.f32 %v2039_v42, %v1933_v36  ;;  %v2041_v44 = vpop.f32.mrb[22].mxu1  ;;  %v2331_v36 = vld [vmem:[#allocation3 + $0x390] sm:$0xff]  ;;  %v1936_v38 = vsub.s32 4, %v3716_v58 }
 0x5cd   :  { %2355 = vmatprep.subr.bf16.mxu0 %v2312_v39  ;;  %v2128_v47 = vmax.f32 %v2038_v41, 0.0  ;;  %v2042_v48 = vpop.f32.mrb[23].mxu1  ;;  %v2333_v39 = vld [vmem:[#allocation3 + $0x3e0] sm:$0xff]  ;;  %v2335_v42 = vld [vmem:[#allocation3 + $0x430] sm:$0xff] }
 0x5ce   :  { %v2129_v50 = vmax.f32 %v2040_v43, 0.0  ;;  %v1937_v41 = vrot.slane %v3830_v21, %v1936_v38  ;;  %v2338_v43 = vld [vmem:[#allocation3 + $0x488] sm:$0xff] }
 0x5cf   :  { %v2254_v51 = vpack.c.bf16 %v2128_v47, %v2128_v47  ;;  %v2340_v47 = vld [vmem:[#allocation3 + $0x4d8] sm:$0xff] }
 0x5d0   :  { %2356 = vmatpush1.bf16.msra.mxu0 %v2311_v46  ;;  %v2255_v52 = vpack.c.bf16 %v2129_v50, %v2129_v50  ;;  %v2337_v46 = vld [vmem:[#allocation3 + $0x480] sm:$0xff]  ;;  %v2484_v50 = vld [vmem:[#allocation3 + $0x48] sm:$0xff] }
 0x5d1   :  { %2357 = vmatprep.subr.bf16.mxu0 %v2314_v49  ;;  %v2339_v49 = vld [vmem:[#allocation3 + $0x4d0] sm:$0xff] }
 0x5d2   :  { %v3848_v60 = vpop.f32.mrb[24].mxu1  ;;  %2298 = vmatprep.mubr.bf16.mxu1 %v2255_v52  ;;  %v2483_v52 = vld [vmem:[#allocation3 + $0x40] sm:$0xff] }
 0x5d3   :  { %v2080_v63 = vpop.f32.mrb[25].mxu1  ;;  %2299 = vmatmul.mubr.bf16.vlgmr.msra.gmra.mrb[32].mxu1 %v2254_v51  ;;  %v2079_v44 = vadd.f32 %v3848_v60, %v1937_v41  ;;  %v2490_v60 = vld [vmem:[#allocation3 + $0x138] sm:$0xff]  ;;  %v2422_v41 = vld [vmem:[#allocation3 + $0x440] sm:$0xff] }
 0x5d4   :  { %2358 = vmatpush1.bf16.msra.mxu0 %v2313_v54  ;;  %v2081_v0 = vadd.f32 %v2080_v63, %v1941_v53  ;;  %v2082_v1 = vpop.f32.mrb[26].mxu1  ;;  %2441 = vmatpush1.bf16.msra.mxu1 %v2396_v55  ;;  %v2486_v53 = vld [vmem:[#allocation3 + $0x98] sm:$0xff]  ;;  %v2485_v54 = vld [vmem:[#allocation3 + $0x90] sm:$0xff]  ;;  %v2488_v55 = vld [vmem:[#allocation3 + $0xe8] sm:$0xff] }
 0x5d5   :  { %2359 = vmatprep.subr.bf16.mxu0 %v2316_v56  ;;  %v2083_v3 = vpop.f32.mrb[27].mxu1  ;;  %2442 = vmatprep.subr.bf16.mxu1 %v2399_v61  ;;  %v2130_v48 = vmax.f32 %v2079_v44, 0.0  ;;  %v2487_v56 = vld [vmem:[#allocation3 + $0xe0] sm:$0xff]  ;;  %v2489_v61 = vld [vmem:[#allocation3 + $0x130] sm:$0xff]  ;;  %v2492_v63 = vld [vmem:[#allocation3 + $0x188] sm:$0xff] }
 0x5d6   :  { %v2131_v6 = vmax.f32 %v2081_v0, 0.0  ;;  %v2491_v0 = vld [vmem:[#allocation3 + $0x180] sm:$0xff]  ;;  %v2494_v1 = vld [vmem:[#allocation3 + $0x1d8] sm:$0xff] }
 0x5d7   :  { %v2341_v51 = vpack.c.bf16 %v2130_v48, %v2130_v48  ;;  %v2410_v3 = vld [vmem:[#allocation3 + $0x260] sm:$0xff]  ;;  %v2427_v48 = vld [vmem:[#allocation3 + $0x4e8] sm:$0xff] }
 0x5d8   :  { %2360 = vmatpush1.bf16.msra.mxu0 %v2315_v2  ;;  %v2342_v8 = vpack.c.bf16 %v2131_v6, %v2131_v6  ;;  %2443 = vmatpush1.bf16.msra.mxu1 %v2398_v4  ;;  %v2493_v2 = vld [vmem:[#allocation3 + $0x1d0] sm:$0xff]  ;;  %v2496_v4 = vld [vmem:[#allocation3 + $0x228] sm:$0xff]  ;;  %v2495_v6 = vld [vmem:[#allocation3 + $0x220] sm:$0xff] }
 0x5d9   :  { %2361 = vmatprep.subr.bf16.mxu0 %v2318_v5  ;;  %2444 = vmatprep.subr.bf16.mxu1 %v2401_v7  ;;  %v2413_v5 = vld [vmem:[#allocation3 + $0x2b8] sm:$0xff]  ;;  %v2412_v7 = vld [vmem:[#allocation3 + $0x2b0] sm:$0xff] }
 0x5da   :  { %2385 = vmatprep.mubr.bf16.mxu0 %v2342_v8  ;;  %v2498_v8 = vld [vmem:[#allocation3 + $0x278] sm:$0xff] }
 0x5dc   :  { %2362 = vmatpush1.bf16.msra.mxu0 %v2317_v9  ;;  %2445 = vmatpush1.bf16.msra.mxu1 %v2400_v10  ;;  %v2415_v9 = vld [vmem:[#allocation3 + $0x308] sm:$0xff]  ;;  %v2414_v10 = vld [vmem:[#allocation3 + $0x300] sm:$0xff] }
 0x5dd   :  { %2363 = vmatprep.subr.bf16.mxu0 %v2320_v11  ;;  %2446 = vmatprep.subr.bf16.mxu1 %v2403_v12  ;;  %v2497_v11 = vld [vmem:[#allocation3 + $0x270] sm:$0xff]  ;;  %v2500_v12 = vld [vmem:[#allocation3 + $0x2c8] sm:$0xff] }
 0x5e0   :  { %2364 = vmatpush1.bf16.msra.mxu0 %v2319_v13  ;;  %2447 = vmatpush1.bf16.msra.mxu1 %v2402_v14  ;;  %v2417_v13 = vld [vmem:[#allocation3 + $0x358] sm:$0xff]  ;;  %v2416_v14 = vld [vmem:[#allocation3 + $0x350] sm:$0xff] }
 0x5e1   :  { %2365 = vmatprep.subr.bf16.mxu0 %v2322_v15  ;;  %2448 = vmatprep.subr.bf16.mxu1 %v2405_v16  ;;  %v2119_v15 = vpop.f32.mrb[28].mxu1  ;;  %v1948_v16 = vsub.s32 7, %v3716_v58 }
 0x5e4   :  { %2366 = vmatpush1.bf16.msra.mxu0 %v2321_v17  ;;  %2449 = vmatpush1.bf16.msra.mxu1 %v2404_v18  ;;  %v2419_v17 = vld [vmem:[#allocation3 + $0x3a8] sm:$0xff]  ;;  %v2121_v18 = vpop.f32.mrb[29].mxu1 }
 0x5e5   :  { %2367 = vmatprep.subr.bf16.mxu0 %v2324_v19  ;;  %2450 = vmatprep.subr.bf16.mxu1 %v2407_v20  ;;  %v2499_v19 = vld [vmem:[#allocation3 + $0x2c0] sm:$0xff]  ;;  %v1949_v20 = vrot.slane %v3830_v21, %v1948_v16 }
 0x5e8   :  { %2368 = vmatpush1.bf16.msra.mxu0 %v2323_v22  ;;  %2451 = vmatpush1.bf16.msra.mxu1 %v2406_v23  ;;  %v2123_v22 = vpop.f32.mrb[30].mxu1  ;;  %v2502_v23 = vld [vmem:[#allocation3 + $0x318] sm:$0xff] }
 0x5e9   :  { %2369 = vmatprep.subr.bf16.mxu0 %v2326_v24  ;;  %2452 = vmatprep.subr.bf16.mxu1 %v2409_v25  ;;  %v2124_v24 = vpop.f32.mrb[31].mxu1  ;;  %v2418_v25 = vld [vmem:[#allocation3 + $0x3a0] sm:$0xff] }
 0x5ec   :  { %2370 = vmatpush1.bf16.msra.mxu0 %v2325_v26  ;;  %2453 = vmatpush1.bf16.msra.mxu1 %v2408_v28  ;;  %v2122_v26 = vadd.f32 %v2121_v18, %v1949_v20  ;;  %v2421_v28 = vld [vmem:[#allocation3 + $0x3f8] sm:$0xff] }
 0x5ed   :  { %2371 = vmatprep.subr.bf16.mxu0 %v2328_v29  ;;  %2454 = vmatprep.subr.bf16.mxu1 %v2411_v32  ;;  %v2501_v29 = vld [vmem:[#allocation3 + $0x310] sm:$0xff]  ;;  %v1944_v32 = vsub.s32 6, %v3716_v58 }
 0x5f0   :  { %2372 = vmatpush1.bf16.msra.mxu0 %v2327_v33  ;;  %2455 = vmatpush1.bf16.msra.mxu1 %v2410_v3  ;;  %v2133_v33 = vmax.f32 %v2122_v26, 0.0  ;;  %v2695_v3 = vld [vmem:[#allocation4 + $0x140] sm:$0xff] }
 0x5f1   :  { %2373 = vmatprep.subr.bf16.mxu0 %v2330_v31  ;;  %2456 = vmatprep.subr.bf16.mxu1 %v2413_v5  ;;  %v2504_v31 = vld [vmem:[#allocation3 + $0x368] sm:$0xff]  ;;  %v2600_v5 = vld [vmem:[#allocation4 + $0xd8] sm:$0xff] }
 0x5f4   :  { %2374 = vmatpush1.bf16.msra.mxu0 %v2329_v34  ;;  %2457 = vmatpush1.bf16.msra.mxu1 %v2412_v7  ;;  %v2420_v34 = vld [vmem:[#allocation3 + $0x3f0] sm:$0xff]  ;;  %v2601_v7 = vld [vmem:[#allocation4 + $0xe0] sm:$0xff] }
 0x5f5   :  { %2375 = vmatprep.subr.bf16.mxu0 %v2332_v35  ;;  %2458 = vmatprep.subr.bf16.mxu1 %v2415_v9  ;;  %v2429_v35 = vpack.c.bf16 %v2133_v33, %v2133_v33  ;;  %v2602_v9 = vld [vmem:[#allocation4 + $0xe8] sm:$0xff] }
 0x5f7   :  { %2472 = vmatprep.mubr.bf16.mxu1 %v2429_v35 }
 0x5f8   :  { %2376 = vmatpush1.bf16.msra.mxu0 %v2331_v36  ;;  %2459 = vmatpush1.bf16.msra.mxu1 %v2414_v10  ;;  %v2423_v36 = vld [vmem:[#allocation3 + $0x448] sm:$0xff] }
 0x5f9   :  { %2377 = vmatprep.subr.bf16.mxu0 %v2334_v37  ;;  %2460 = vmatprep.subr.bf16.mxu1 %v2417_v13  ;;  %v2503_v37 = vld [vmem:[#allocation3 + $0x360] sm:$0xff]  ;;  %v2594_v10 = vld [vmem:[#allocation4 + $0xa8] sm:$0xff]  ;;  %v2604_v13 = vld [vmem:[#allocation4 + $0xf8] sm:$0xff] }
 0x5fc   :  { %2378 = vmatpush1.bf16.msra.mxu0 %v2333_v39  ;;  %2461 = vmatpush1.bf16.msra.mxu1 %v2416_v14  ;;  %v1945_v39 = vrot.slane %v3830_v21, %v1944_v32  ;;  %v2510_v21 = vld [vmem:[#allocation3 + $0x458] sm:$0xff] }
 0x5fd   :  { %2379 = vmatprep.subr.bf16.mxu0 %v2336_v40  ;;  %2462 = vmatprep.subr.bf16.mxu1 %v2419_v17  ;;  %v2506_v40 = vld [vmem:[#allocation3 + $0x3b8] sm:$0xff] }
 0x5fe   :  { %v2120_v44 = vadd.f32 %v2119_v15, %v1945_v39  ;;  %v2596_v14 = vld [vmem:[#allocation4 + $0xb8] sm:$0xff]  ;;  %v2579_v15 = vld [vmem:[#allocation4 + $0x40] sm:$0xff] }
 0x5ff   :  { %v3866_v17 = vld [vmem:[%s3915_s8 + $0x1] ss:$4 sm:$0xff] }
 0x600   :  { %2380 = vmatpush1.bf16.msra.mxu0 %v2335_v42  ;;  %2463 = vmatpush1.bf16.msra.mxu1 %v2418_v25  ;;  %v2425_v42 = vld [vmem:[#allocation3 + $0x498] sm:$0xff]  ;;  %v2172_v18 = vrot.slane %v3866_v17, %v3719_v59  ;;  %v2259_v33 = vrot.slane %v3866_v17, %v1928_v27 }
 0x601   :  { %2381 = vmatprep.subr.bf16.mxu0 %v2338_v43  ;;  %2464 = vmatprep.subr.bf16.mxu1 %v2421_v28  ;;  %v2505_v43 = vld [vmem:[#allocation3 + $0x3b0] sm:$0xff] }
 0x604   :  { %2382 = vmatpush1.bf16.msra.mxu0 %v2337_v46  ;;  %2465 = vmatpush1.bf16.msra.mxu1 %v2420_v34  ;;  %v2508_v46 = vld [vmem:[#allocation3 + $0x408] sm:$0xff]  ;;  %v2263_v34 = vrot.slane %v3866_v17, %v1932_v30 }
 0x605   :  { %2383 = vmatprep.subr.bf16.mxu0 %v2340_v47  ;;  %2466 = vmatprep.subr.bf16.mxu1 %v2423_v36  ;;  %v2424_v47 = vld [vmem:[#allocation3 + $0x490] sm:$0xff]  ;;  %v2687_v36 = vld [vmem:[#allocation4 + $0x100] sm:$0xff] }
 0x608   :  { %2384 = vmatpush1.bf16.msra.mxu0 %v2339_v49  ;;  %2467 = vmatpush1.bf16.msra.mxu1 %v2422_v41  ;;  %v2507_v49 = vld [vmem:[#allocation3 + $0x400] sm:$0xff] }
 0x609   :  { %2528 = vmatprep.subr.bf16.mxu0 %v2484_v50  ;;  %2468 = vmatprep.subr.bf16.mxu1 %v2425_v42  ;;  %v2132_v50 = vmax.f32 %v2120_v44, 0.0  ;;  %v2688_v44 = vld [vmem:[#allocation4 + $0x108] sm:$0xff] }
 0x60b   :  { %2386 = vmatmul.mubr.bf16.vlgmr.msra.gmra.mrb[20].mxu0 %v2341_v51  ;;  %v2426_v51 = vld [vmem:[#allocation3 + $0x4e0] sm:$0xff] }
 0x60c   :  { %2529 = vmatpush1.bf16.msra.mxu0 %v2483_v52  ;;  %2469 = vmatpush1.bf16.msra.mxu1 %v2424_v47  ;;  %v2597_v52 = vld [vmem:[#allocation4 + $0xc0] sm:$0xff]  ;;  %v2697_v47 = vld [vmem:[#allocation4 + $0x150] sm:$0xff] }
 0x60d   :  { %2530 = vmatprep.subr.bf16.mxu0 %v2486_v53  ;;  %2470 = vmatprep.subr.bf16.mxu1 %v2427_v48  ;;  %v2509_v53 = vld [vmem:[#allocation3 + $0x450] sm:$0xff] }
 0x610   :  { %2531 = vmatpush1.bf16.msra.mxu0 %v2485_v54  ;;  %v2428_v54 = vpack.c.bf16 %v2132_v50, %v2132_v50  ;;  %2471 = vmatpush1.bf16.msra.mxu1 %v2426_v51  ;;  %v2689_v50 = vld [vmem:[#allocation4 + $0x110] sm:$0xff]  ;;  %v2698_v51 = vld [vmem:[#allocation4 + $0x158] sm:$0xff] }
 0x611   :  { %2532 = vmatprep.subr.bf16.mxu0 %v2488_v55  ;;  %v2512_v55 = vld [vmem:[#allocation3 + $0x4a8] sm:$0xff]  ;;  %3091 = vmatprep.subr.bf16.mxu1 %v2597_v52 }
 0x612   :  { %v2580_v52 = vld [vmem:[#allocation4 + $0x48] sm:$0xff] }
 0x613   :  { %2473 = vmatmul.mubr.bf16.vlgmr.msra.gmra.mrb[36].mxu1 %v2428_v54  ;;  %v2572_v54 = vld [vmem:[#allocation4 + $0x8] sm:$0xff] }
 0x614   :  { %2533 = vmatpush1.bf16.msra.mxu0 %v2487_v56  ;;  %v2589_v56 = vld [vmem:[#allocation4 + $0x80] sm:$0xff] }
 0x615   :  { %2534 = vmatprep.subr.bf16.mxu0 %v2490_v60  ;;  %v2598_v60 = vld [vmem:[#allocation4 + $0xc8] sm:$0xff]  ;;  %3092 = vmatpush3.bf16.msra.mxu1 %v2589_v56  ;;  %v2581_v56 = vld [vmem:[#allocation4 + $0x50] sm:$0xff] }
 0x616   :  { %3093 = vmatprep.subr.bf16.mxu1 %v2598_v60  ;;  %v2691_v60 = vld [vmem:[#allocation4 + $0x120] sm:$0xff] }
 0x618   :  { %2535 = vmatpush1.bf16.msra.mxu0 %v2489_v61  ;;  %v2511_v61 = vld [vmem:[#allocation3 + $0x4a0] sm:$0xff] }
 0x619   :  { %2536 = vmatprep.subr.bf16.mxu0 %v2492_v63  ;;  %v2514_v63 = vld [vmem:[#allocation3 + $0x4f8] sm:$0xff] }
 0x61c   :  { %2537 = vmatpush1.bf16.msra.mxu0 %v2491_v0  ;;  %v2590_v0 = vld [vmem:[#allocation4 + $0x88] sm:$0xff] }
 0x61d   :  { %2538 = vmatprep.subr.bf16.mxu0 %v2494_v1  ;;  %v2599_v1 = vld [vmem:[#allocation4 + $0xd0] sm:$0xff]  ;;  %3094 = vmatpush3.bf16.msra.mxu1 %v2590_v0  ;;  %v2582_v0 = vld [vmem:[#allocation4 + $0x58] sm:$0xff] }
 0x61e   :  { %3095 = vmatprep.subr.bf16.mxu1 %v2599_v1  ;;  %v2692_v1 = vld [vmem:[#allocation4 + $0x128] sm:$0xff] }
 0x620   :  { %2539 = vmatpush1.bf16.msra.mxu0 %v2493_v2  ;;  %v2513_v2 = vld [vmem:[#allocation3 + $0x4f0] sm:$0xff] }
 0x621   :  { %2540 = vmatprep.subr.bf16.mxu0 %v2496_v4  ;;  %v2591_v4 = vld [vmem:[#allocation4 + $0x90] sm:$0xff] }
 0x622   :  { %3096 = vmatpush3.bf16.msra.mxu1 %v2591_v4  ;;  %v2583_v4 = vld [vmem:[#allocation4 + $0x60] sm:$0xff] }
 0x623   :  { %3097 = vmatprep.subr.bf16.mxu1 %v2600_v5  ;;  %v2693_v5 = vld [vmem:[#allocation4 + $0x130] sm:$0xff] }
 0x624   :  { %2541 = vmatpush1.bf16.msra.mxu0 %v2495_v6  ;;  %v2592_v6 = vld [vmem:[#allocation4 + $0x98] sm:$0xff] }
 0x625   :  { %2542 = vmatprep.subr.bf16.mxu0 %v2498_v8  ;;  %v2593_v8 = vld [vmem:[#allocation4 + $0xa0] sm:$0xff] }
 0x626   :  { %3098 = vmatpush3.bf16.msra.mxu1 %v2592_v6  ;;  %v2575_v6 = vld [vmem:[#allocation4 + $0x20] sm:$0xff] }
 0x627   :  { %3099 = vmatprep.subr.bf16.mxu1 %v2601_v7  ;;  %v2702_v7 = vld [vmem:[#allocation4 + $0x178] sm:$0xff] }
 0x628   :  { %2543 = vmatpush1.bf16.msra.mxu0 %v2497_v11  ;;  %v2603_v11 = vld [vmem:[#allocation4 + $0xf0] sm:$0xff] }
 0x629   :  { %2544 = vmatprep.subr.bf16.mxu0 %v2500_v12  ;;  %v2595_v12 = vld [vmem:[#allocation4 + $0xb0] sm:$0xff] }
 0x62a   :  { %3100 = vmatpush3.bf16.msra.mxu1 %v2593_v8  ;;  %v2584_v8 = vld [vmem:[#allocation4 + $0x68] sm:$0xff] }
 0x62b   :  { %3101 = vmatprep.subr.bf16.mxu1 %v2602_v9  ;;  %v2694_v9 = vld [vmem:[#allocation4 + $0x138] sm:$0xff] }
 0x62c   :  { %2545 = vmatpush1.bf16.msra.mxu0 %v2499_v19  ;;  %v2176_v19 = vrot.slane %v3866_v17, %v3725_v62 }
 0x62d   :  { %2546 = vmatprep.subr.bf16.mxu0 %v2502_v23 }
 0x62e   :  { %3102 = vmatpush3.bf16.msra.mxu1 %v2594_v10  ;;  %v2576_v10 = vld [vmem:[#allocation4 + $0x28] sm:$0xff] }
 0x62f   :  { %3103 = vmatprep.subr.bf16.mxu1 %v2603_v11  ;;  %v2346_v11 = vrot.slane %v3866_v17, %v1936_v38  ;;  %v2586_v38 = vld [vmem:[#allocation4 + $0x78] sm:$0xff] }
 0x630   :  { %2547 = vmatpush1.bf16.msra.mxu0 %v2501_v29 }
 0x631   :  { %2548 = vmatprep.subr.bf16.mxu0 %v2504_v31 }
 0x632   :  { %3104 = vmatpush3.bf16.msra.mxu1 %v2595_v12  ;;  %v2350_v12 = vrot.slane %v3866_v17, %v1940_v45  ;;  %v2754_v45 = vld [vmem:[#allocation4 + $0x1c0] sm:$0xff] }
 0x633   :  { %3105 = vmatprep.subr.bf16.mxu1 %v2604_v13 }
 0x634   :  { %2549 = vmatpush1.bf16.msra.mxu0 %v2503_v37  ;;  %v2696_v37 = vld [vmem:[#allocation4 + $0x148] sm:$0xff] }
 0x635   :  { %2550 = vmatprep.subr.bf16.mxu0 %v2506_v40 }
 0x636   :  { %3106 = vmatpush3.bf16.msra.mxu1 %v2596_v14 }
 0x637   :  { %3113 = vmatprep.subr.bf16.mxu1 %v2579_v15 }
 0x638   :  { %2551 = vmatpush1.bf16.msra.mxu0 %v2505_v43 }
 0x639   :  { %2552 = vmatprep.subr.bf16.mxu0 %v2508_v46 }
 0x63c   :  { %2553 = vmatpush1.bf16.msra.mxu0 %v2507_v49 }
 0x63d   :  { %2554 = vmatprep.subr.bf16.mxu0 %v2510_v21  ;;  %v2571_v21 = vld [vmem:[#allocation4] sm:$0xff] }
 0x640   :  { %2555 = vmatpush1.bf16.msra.mxu0 %v2509_v53  ;;  %v2690_v53 = vld [vmem:[#allocation4 + $0x118] sm:$0xff] }
 0x641   :  { %2556 = vmatprep.subr.bf16.mxu0 %v2512_v55  ;;  %v2699_v55 = vld [vmem:[#allocation4 + $0x160] sm:$0xff] }
 0x644   :  { %2557 = vmatpush1.bf16.msra.mxu0 %v2511_v61  ;;  %v2573_v61 = vld [vmem:[#allocation4 + $0x10] sm:$0xff] }
 0x645   :  { %2558 = vmatprep.subr.bf16.mxu0 %v2514_v63  ;;  %v2700_v63 = vld [vmem:[#allocation4 + $0x168] sm:$0xff] }
 0x648   :  { %2559 = vmatpush1.bf16.msra.mxu0 %v2513_v2  ;;  %v2574_v2 = vld [vmem:[#allocation4 + $0x18] sm:$0xff] }
 0x649   :  { %3135 = vmatprep.subr.bf16.mxu0 %v2695_v3  ;;  %v2701_v3 = vld [vmem:[#allocation4 + $0x170] sm:$0xff] }
 0x69e   :  { %v2213_v20 = vpop.f32.mrb[16].mxu0 }
 0x69f   :  { %v2214_v22 = vadd.f32 %v2213_v20, %v2172_v18  ;;  %v2215_v23 = vpop.f32.mrb[17].mxu0 }
 0x6a0   :  { %v2216_v24 = vadd.f32 %v2215_v23, %v2176_v19  ;;  %v2217_v25 = vpop.f32.mrb[18].mxu0 }
 0x6a1   :  { %v2220_v26 = vmax.f32 %v2214_v22, 0.0  ;;  %v2218_v28 = vpop.f32.mrb[19].mxu0 }
 0x6a2   :  { %v2221_v29 = vmax.f32 %v2216_v24, 0.0  ;;  %v2577_v28 = vld [vmem:[#allocation4 + $0x30] sm:$0xff] }
 0x6a3   :  { %v2515_v35 = vpack.c.bf16 %v2220_v26, %v2220_v26  ;;  %v2585_v26 = vld [vmem:[#allocation4 + $0x70] sm:$0xff] }
 0x6a4   :  { %v2516_v31 = vpack.c.bf16 %v2221_v29, %v2221_v29  ;;  %v2578_v29 = vld [vmem:[#allocation4 + $0x38] sm:$0xff] }
 0x6a6   :  { %2560 = vmatprep.mubr.bf16.mxu0 %v2516_v31  ;;  %v2300_v39 = vpop.f32.mrb[32].mxu1 }
 0x6a7   :  { %2561 = vmatmul.mubr.bf16.vlgmr.msra.gmra.mrb[24].mxu0 %v2515_v35  ;;  %v2301_v40 = vadd.f32 %v2300_v39, %v2259_v33  ;;  %v2302_v41 = vpop.f32.mrb[33].mxu1 }
 0x6a8   :  { %3136 = vmatpush3.bf16.msra.mxu0 %v2687_v36  ;;  %v2303_v42 = vadd.f32 %v2302_v41, %v2263_v34  ;;  %v2304_v43 = vpop.f32.mrb[34].mxu1  ;;  %v3061_v36 = vld [vmem:[%s3915_s8 + $0x2] ss:$4 sm:$0x3] }
 0x6a9   :  { %3137 = vmatprep.subr.bf16.mxu0 %v2696_v37  ;;  %v2307_v46 = vmax.f32 %v2301_v40, 0.0  ;;  %v2305_v27 = vpop.f32.mrb[35].mxu1  ;;  %v2437_v37 = vrot.slane %v3866_v17, %v1948_v16  ;;  %v2521_v39 = vrot.slane %v3061_v36, %v3719_v59  ;;  %v2525_v40 = vrot.slane %v3061_v36, %v3725_v62  ;;  %v2755_v16 = vld [vmem:[#allocation4 + $0x1c8] sm:$0xff] }
 0x6aa   :  { %v2308_v48 = vmax.f32 %v2303_v42, 0.0 }
 0x6ab   :  { %v2605_v49 = vpack.c.bf16 %v2307_v46, %v2307_v46 }
 0x6ac   :  { %3138 = vmatpush3.bf16.msra.mxu0 %v2688_v44  ;;  %v2606_v30 = vpack.c.bf16 %v2308_v48, %v2308_v48 }
 0x6ad   :  { %3139 = vmatprep.subr.bf16.mxu0 %v2697_v47 }
 0x6ae   :  { %2639 = vmatprep.mubr.bf16.mxu1 %v2606_v30 }
 0x6af   :  { %2640 = vmatmul.mubr.bf16.vlgmr.msra.gmra.mrb[40].mxu1 %v2605_v49 }
 0x6b0   :  { %3140 = vmatpush3.bf16.msra.mxu0 %v2689_v50  ;;  %3114 = vmatpush3.bf16.msra.mxu1 %v2571_v21 }
 0x6b1   :  { %3141 = vmatprep.subr.bf16.mxu0 %v2698_v51  ;;  %3115 = vmatprep.subr.bf16.mxu1 %v2580_v52  ;;  %v2746_v52 = vld [vmem:[#allocation4 + $0x180] sm:$0xff] }
 0x6b4   :  { %3142 = vmatpush3.bf16.msra.mxu0 %v2690_v53  ;;  %3116 = vmatpush3.bf16.msra.mxu1 %v2572_v54 }
 0x6b5   :  { %3143 = vmatprep.subr.bf16.mxu0 %v2699_v55  ;;  %3117 = vmatprep.subr.bf16.mxu1 %v2581_v56  ;;  %v2747_v55 = vld [vmem:[#allocation4 + $0x188] sm:$0xff] }
 0x6b8   :  { %3144 = vmatpush3.bf16.msra.mxu0 %v2691_v60  ;;  %3118 = vmatpush3.bf16.msra.mxu1 %v2573_v61  ;;  %v2756_v60 = vld [vmem:[#allocation4 + $0x1d0] sm:$0xff] }
 0x6b9   :  { %3145 = vmatprep.subr.bf16.mxu0 %v2700_v63  ;;  %3119 = vmatprep.subr.bf16.mxu1 %v2582_v0  ;;  %v2748_v61 = vld [vmem:[#allocation4 + $0x190] sm:$0xff]  ;;  %v2757_v63 = vld [vmem:[#allocation4 + $0x1d8] sm:$0xff] }
 0x6ba   :  { %v2749_v0 = vld [vmem:[#allocation4 + $0x198] sm:$0xff] }
 0x6bc   :  { %3146 = vmatpush3.bf16.msra.mxu0 %v2692_v1  ;;  %3120 = vmatpush3.bf16.msra.mxu1 %v2574_v2  ;;  %v2758_v1 = vld [vmem:[#allocation4 + $0x1e0] sm:$0xff] }
 0x6bd   :  { %3147 = vmatprep.subr.bf16.mxu0 %v2701_v3  ;;  %3121 = vmatprep.subr.bf16.mxu1 %v2583_v4  ;;  %v2750_v2 = vld [vmem:[#allocation4 + $0x1a0] sm:$0xff]  ;;  %v2759_v3 = vld [vmem:[#allocation4 + $0x1e8] sm:$0xff]  ;;  %v2433_v4 = vrot.slane %v3866_v17, %v1944_v32 }
 0x6c0   :  { %3148 = vmatpush3.bf16.msra.mxu0 %v2693_v5  ;;  %3122 = vmatpush3.bf16.msra.mxu1 %v2575_v6  ;;  %v2751_v5 = vld [vmem:[#allocation4 + $0x1a8] sm:$0xff]  ;;  %v2760_v6 = vld [vmem:[#allocation4 + $0x1f0] sm:$0xff] }
 0x6c1   :  { %3149 = vmatprep.subr.bf16.mxu0 %v2702_v7  ;;  %3123 = vmatprep.subr.bf16.mxu1 %v2584_v8  ;;  %v2752_v8 = vld [vmem:[#allocation4 + $0x1b0] sm:$0xff] }
 0x6c4   :  { %3150 = vmatpush3.bf16.msra.mxu0 %v2694_v9  ;;  %3124 = vmatpush3.bf16.msra.mxu1 %v2576_v10  ;;  %v2761_v9 = vld [vmem:[#allocation4 + $0x1f8] sm:$0xff] }
 0x6c5   :  { %3125 = vmatprep.subr.bf16.mxu1 %v2585_v26 }
 0x6c8   :  { %3126 = vmatpush3.bf16.msra.mxu1 %v2577_v28 }
 0x6c9   :  { %3127 = vmatprep.subr.bf16.mxu1 %v2586_v38 }
 0x6cc   :  { %3128 = vmatpush3.bf16.msra.mxu1 %v2578_v29 }
 0x6cd   :  { %3157 = vmatprep.subr.bf16.mxu1 %v2754_v45  ;;  %v1899_v45 = vld [vmem:[%s3915_s8 + $0xa] sm:$0x1] }
 0x6de   :  { %v2387_v13 = vpop.f32.mrb[20].mxu0 }
 0x6df   :  { %v2388_v14 = vadd.f32 %v2387_v13, %v2346_v11  ;;  %v2389_v15 = vpop.f32.mrb[21].mxu0  ;;  %v2753_v11 = vld [vmem:[#allocation4 + $0x1b8] sm:$0xff] }
 0x6e0   :  { %v2390_v18 = vadd.f32 %v2389_v15, %v2350_v12  ;;  %v2391_v19 = vpop.f32.mrb[22].mxu0 }
 0x6e1   :  { %v2394_v20 = vmax.f32 %v2388_v14, 0.0  ;;  %v2392_v22 = vpop.f32.mrb[23].mxu0 }
 0x6e2   :  { %v2395_v23 = vmax.f32 %v2390_v18, 0.0 }
 0x6e3   :  { %v2703_v24 = vpack.c.bf16 %v2394_v20, %v2394_v20 }
 0x6e4   :  { %v2704_v25 = vpack.c.bf16 %v2395_v23, %v2395_v23 }
 0x6e6   :  { %2737 = vmatprep.mubr.bf16.mxu0 %v2704_v25  ;;  %v2474_v33 = vpop.f32.mrb[36].mxu1  ;;  %v2807_v25 = vand.u32 127, %v282_v57 }
 0x6e7   :  { %2738 = vmatmul.mubr.bf16.vlgmr.msra.gmra.mrb[28].mxu0 %v2703_v24  ;;  %v2476_v31 = vpop.f32.mrb[37].mxu1  ;;  %v2475_v7 = vadd.f32 %v2474_v33, %v2433_v4 }
 0x6e8   :  { %v2478_v34 = vpop.f32.mrb[38].mxu1  ;;  %v2477_v41 = vadd.f32 %v2476_v31, %v2437_v37  ;;  %vm2812_vm4 = vcmp.ge.s32.totalorder %v2807_v25, 16  ;;  %vm2813_vm5 = vcmp.lt.s32.totalorder %v2807_v25, 64  ;;  %vm2808_vm7 = vcmp.lt.s32.totalorder %v2807_v25, 4 }
 0x6e9   :  { %v2479_v35 = vpop.f32.mrb[39].mxu1  ;;  %v2481_v10 = vmax.f32 %v2475_v7, 0.0  ;;  %vm2814_vm6 = vmand %vm2812_vm4, %vm2813_vm5  ;;  %vm2809_vm8 = vcmp.ge.s32.totalorder %v2807_v25, 4  ;;  %vm2810_vm9 = vcmp.lt.s32.totalorder %v2807_v25, 16 }
 0x6ea   :  { %v2482_v47 = vmax.f32 %v2477_v41, 0.0  ;;  %vm2811_vm10 = vmand %vm2809_vm8, %vm2810_vm9 }
 0x6eb   :  { %v2762_v12 = vpack.c.bf16 %v2481_v10, %v2481_v10 }
 0x6ec   :  { %v2763_v21 = vpack.c.bf16 %v2482_v47, %v2482_v47 }
 0x77a   :  { %v2562_v42 = vpop.f32.mrb[24].mxu0 }
 0x77b   :  { %v2563_v43 = vadd.f32 %v2562_v42, %v2521_v39  ;;  %v2564_v44 = vpop.f32.mrb[25].mxu0 }
 0x77c   :  { %v2565_v46 = vadd.f32 %v2564_v44, %v2525_v40  ;;  %v2566_v27 = vpop.f32.mrb[26].mxu0 }
 0x77d   :  { %v2569_v48 = vmax.f32 %v2563_v43, 0.0  ;;  %v2567_v49 = vpop.f32.mrb[27].mxu0 }
 0x77e   :  { %v2570_v30 = vmax.f32 %v2565_v46, 0.0 }
 0x77f   :  { %v2587_v51 = vpack.c.bf16 %v2569_v48, %v2569_v48 }
 0x780   :  { %v2588_v50 = vpack.c.bf16 %v2570_v30, %v2570_v30 }
 0x782   :  { %2679 = vmatprep.mubr.bf16.mxu1 %v2588_v50  ;;  %v3107_v53 = vpop.f32.mrb[40].mxu1 }
 0x783   :  { %2680 = vmatmul.mubr.bf16.vlgmr.msra.gmra.mrb[44].mxu1 %v2587_v51  ;;  %v3108_v59 = vpop.f32.mrb[41].mxu1 }
 0x784   :  { %3158 = vmatpush3.bf16.msra.mxu1 %v2746_v52  ;;  %2796 = vmatprep.mubr.bf16.mxu1 %v2763_v21  ;;  %v3109_v62 = vadd.f32 %v3108_v59, %v3107_v53  ;;  %v3110_v54 = vpop.f32.mrb[42].mxu1 }
 0x785   :  { %3159 = vmatprep.subr.bf16.mxu1 %v2755_v16  ;;  %v3111_v56 = vpop.f32.mrb[43].mxu1 }
 0x788   :  { %3160 = vmatpush3.bf16.msra.mxu1 %v2747_v55 }
 0x789   :  { %3161 = vmatprep.subr.bf16.mxu1 %v2756_v60 }
 0x78c   :  { %3162 = vmatpush3.bf16.msra.mxu1 %v2748_v61 }
 0x78d   :  { %3163 = vmatprep.subr.bf16.mxu1 %v2757_v63 }
 0x790   :  { %3164 = vmatpush3.bf16.msra.mxu1 %v2749_v0 }
 0x791   :  { %3165 = vmatprep.subr.bf16.mxu1 %v2758_v1 }
 0x794   :  { %3166 = vmatpush3.bf16.msra.mxu1 %v2750_v2 }
 0x795   :  { %3167 = vmatprep.subr.bf16.mxu1 %v2759_v3 }
 0x798   :  { %3168 = vmatpush3.bf16.msra.mxu1 %v2751_v5 }
 0x799   :  { %3169 = vmatprep.subr.bf16.mxu1 %v2760_v6 }
 0x79c   :  { %3170 = vmatpush3.bf16.msra.mxu1 %v2752_v8 }
 0x79d   :  { %3171 = vmatprep.subr.bf16.mxu1 %v2761_v9 }
 0x7a0   :  { %3172 = vmatpush3.bf16.msra.mxu1 %v2753_v11 }
 0x7a3   :  { %2797 = vmatmul.mubr.bf16.vlgmr.msra.gmra.mrb[48].mxu1 %v2762_v12 }
 0x7ba   :  { %v3151_v13 = vpop.f32.mrb[28].mxu0 }
 0x7bb   :  { %v3152_v14 = vpop.f32.mrb[29].mxu0 }
 0x7bc   :  { %v3153_v58 = vadd.f32 %v3152_v14, %v3151_v13  ;;  %v3154_v15 = vpop.f32.mrb[30].mxu0 }
 0x7bd   :  { %v3155_v32 = vpop.f32.mrb[31].mxu0 }
 0x856   :  { %v3129_v17 = vpop.f32.mrb[44].mxu1 }
 0x857   :  { %v3130_v18 = vpop.f32.mrb[45].mxu1 }
 0x858   :  { %v3131_v19 = vadd.f32 %v3130_v18, %v3129_v17  ;;  %v3132_v20 = vpop.f32.mrb[46].mxu1 }
 0x859   :  { %v3133_v22 = vpop.f32.mrb[47].mxu1 }
 0x85a   :  { %v2682_v23 = vadd.f32 %v3131_v19, %v3109_v62 }
 0x85c   :  { %v2745_v24 = vadd.f32 %v3153_v58, %v2682_v23 }
 0x876   :  { %v3173_v26 = vpop.f32.mrb[48].mxu1 }
 0x877   :  { %v3174_v28 = vpop.f32.mrb[49].mxu1 }
 0x878   :  { %v3175_v38 = vadd.f32 %v3174_v28, %v3173_v26  ;;  %v3176_v29 = vpop.f32.mrb[50].mxu1 }
 0x879   :  { %v3177_v33 = vpop.f32.mrb[51].mxu1 }
 0x87a   :  { %v2804_v31 = vadd.f32 %v3175_v38, %v2745_v24 }
 0x87c   :  { %v2805_v34 = vadd.f32 %v2804_v31, %v1899_v45 }
 0x87e   :  { %v2828_v35 = vsel %vm2814_vm6, %v2805_v34, 0.0  ;;  %v2815_v36 = vsel %vm2808_vm7, %v2805_v34, -1e+30 }
 0x87f   :  { %v2829_v37 = vmul.f32 1.442695, %v2828_v35  ;;  %v2816_v57 = vsel %vm304_vm0, %v2815_v36, -inf }
 0x880   :  { %2817 = vmax.xlane.f32.xlu0 %v2816_v57 }
 0x881   :  { %3466 = vpow2.f32 %v2829_v37 }
 0x88b   :  { %v3467_v39 = vpop.eup %3466 }
 0x88c   :  { %v2831_v40 = vsel %vm2814_vm6, %v3467_v39, 0.0 }
 0x88d   :  { %v2832_v41 = vsel %vm2811_vm10, %v2805_v34, %v2831_v40 }
 0x90d   :  { %v2818_v42 = vpop.xlane.xlu0 %2817 }
 0x90e   :  { %v2819_v43 = vsub.f32 %v2815_v36, %v2818_v42 }
 0x910   :  { %v2820_v44 = vmul.f32 1.442695, %v2819_v43 }
 0x912   :  { %3468 = vpow2.f32 %v2820_v44 }
 0x91c   :  { %v3469_v46 = vpop.eup %3468 }
 0x91d   :  { %v2822_v27 = vsel %vm2808_vm7, %v3469_v46, 0.0 }
 0x91e   :  { %v2823_v47 = vsel %vm304_vm0, %v2822_v27, 0.0 }
 0x91f   :  { %2824 = vadd.xlane.f32.xlu0 %v2823_v47 }
 0x9ac   :  { %v2825_v48 = vpop.xlane.xlu0 %2824 }
 0x9ad   :  { %3470 = vrcp.f32 %v2825_v48 }
 0x9b7   :  { %v3471_v49 = vpop.eup %3470 }
 0x9b8   :  { %v2827_v30 = vmul.f32 %v3471_v49, %v2822_v27 }
 0x9ba   :  { %v2833_v50 = vsel %vm2808_vm7, %v2827_v30, %v2832_v41 }
 0x9bb   :  { %2834 = vst [vmem:[%s3916_s9] sm:$0x1] %v2833_v50 }
 0x9bc   :  { %2839 = vsyncpa [#allocation7], 1 }
 0x9bd   :  { %2840 = vsyncmov [#allocation5] }
 0x9c0   :  { %s2841_s25 = vpop.sfrf %2840 }
 0x9c1   :  { %p3066_p2 = scmp.ne.s32.totalorder %s2841_s25, 0 }
 0x9c3   :  { %2845 = shalt.err (%p3066_p2)  }
 0x9c4   :  { %2847 = vsyncmov [#allocation5 + $0x1] }
 0x9c7   :  { %s2848_s26 = vpop.sfrf %2847 }
 0x9c8   :  { %p3067_p3 = scmp.ne.s32.totalorder %s2848_s26, 0 }
 0x9ca   :  { %2852 = shalt.err (%p3067_p3)  }
 0x9cb   :  { %2854 = vsyncmov [#allocation5 + $0x2] }
 0x9ce   :  { %s2855_s27 = vpop.sfrf %2854 }
 0x9cf   :  { %p3068_p4 = scmp.ne.s32.totalorder %s2855_s27, 0 }
 0x9d1   :  { %2859 = shalt.err (%p3068_p4)  }

</bundles_post_ra>
